<compile_context>
chip_gen: v7x
topology: tpu7x:2x2x1
jax: 0.10.0
libtpu: 0.0.40
codegen_flags: <defaults>
</compile_context>

<pallas_src>
import functools

import jax
import jax.numpy as jnp
from jax.experimental import pallas as pl
from jax.experimental.pallas import tpu as pltpu


# ---------------------------------------------------------------------------
# Fused kernel: 6x (Ahat @ (X W) + b [, ReLU]) -> pool -> linear -> logsoftmax
# ---------------------------------------------------------------------------

def _fused_gcn_kernel(*refs, num_layers, labels_num):
    # refs layout:
    #   [ahat_hbm, x, w_0..w_{L-1}, b_0..b_{L-1}, pool, w_lin, b_lin]   inputs
    #   [lsm_out]                                                       output
    #   [a_vmem, a_sem]                                                 scratch
    a_hbm = refs[0]
    x_ref = refs[1]
    w_refs = refs[2:2 + num_layers]
    b_refs = refs[2 + num_layers:2 + 2 * num_layers]
    p_ref, wl_ref, bl_ref, lsm_ref = refs[2 + 2 * num_layers:2 + 2 * num_layers + 4]
    a_vmem, a_sem = refs[-2], refs[-1]

    # Kick off the dominant Ahat HBM->VMEM DMA immediately; it runs while the
    # layer-0 X@W matmul executes on the MXU.
    cp = pltpu.make_async_copy(a_hbm, a_vmem, a_sem)
    cp.start()

    # layer-0 feature transform (bf16 MXU inputs, f32 accumulation)
    h = jnp.dot(x_ref[...], w_refs[0][...], preferred_element_type=jnp.float32)

    # Ahat must be resident before the first propagation matmul.
    cp.wait()

    x = None
    for layer in range(num_layers):                 # static unroll (6 layers)
        if layer > 0:
            h = jnp.dot(x, w_refs[layer][...],
                        preferred_element_type=jnp.float32)
        # y = Ahat @ h + b  (f32 epilogue on VPU)
        y = jnp.dot(a_vmem[...], h.astype(jnp.bfloat16),
                    preferred_element_type=jnp.float32) + b_refs[layer][...]
        if layer < num_layers - 1:
            x = jnp.maximum(y, 0.0).astype(jnp.bfloat16)   # ReLU, bf16 carry
        else:
            x = y.astype(jnp.bfloat16)                     # last layer: no ReLU

    # pooled = P @ x   (global_mean_pool or primary-row selection)
    pooled = jnp.dot(p_ref[...], x, preferred_element_type=jnp.float32)
    # logits = pooled @ W_lin + b_lin   (kept f32 after accumulation)
    logits = jnp.dot(pooled.astype(jnp.bfloat16), wl_ref[...],
                     preferred_element_type=jnp.float32) + bl_ref[...]

    # mask zero-padded label columns before the (stable) softmax; logits are
    # f32 so -1e30 is safe (do NOT move this path to bf16).
    col = jax.lax.broadcasted_iota(jnp.int32, logits.shape, 1)
    logits = jnp.where(col < labels_num, logits, -1e30)

    m = jnp.max(logits, axis=-1, keepdims=True)
    z = logits - m
    s = jnp.sum(jnp.exp(z), axis=-1, keepdims=True)
    lsm_ref[...] = (z - jnp.log(s)).astype(lsm_ref.dtype)   # log_softmax(dim=1)


def fused_gcn(ahat, x, ws, bs, pool, w_lin, b_lin, labels_num):
    npad = ahat.shape[0]
    gpad = pool.shape[0]
    lpad = w_lin.shape[1]
    num_layers = len(ws)

    inputs = [ahat, x] + list(ws) + list(bs) + [pool, w_lin, b_lin]

    vmem = pltpu.MemorySpace.VMEM
    in_specs = ([pl.BlockSpec(memory_space=pl.ANY)]            # Ahat stays in HBM
                + [pl.BlockSpec(memory_space=vmem)] * (len(inputs) - 1))
    out_specs = pl.BlockSpec(memory_space=vmem)

    # --- VMEM budget (inputs + Ahat scratch copy + activations + output) -----
    def nbytes(a):
        return int(a.size) * int(a.dtype.itemsize)

    in_bytes = sum(nbytes(a) for a in inputs)
    out_bytes = gpad * lpad * 4
    max_width = max([x.shape[1]] + [w.shape[1] for w in ws])
    act_bytes = 3 * npad * max_width * 4                # live f32/bf16 temporaries
    total_vmem = in_bytes + nbytes(ahat) + out_bytes + act_bytes
    # Floor at 32 MiB, cap at 64 MiB (safe on every generation incl. v7x).
    vmem_limit = int(min(max(2 * total_vmem, 32 << 20), 64 << 20))

    # --- cost estimate so XLA overlaps wrapper-side prep with the call -------
    flops = 0
    k = x.shape[1]
    for w in ws:
        n = w.shape[1]
        flops += 2 * npad * k * n        # X @ W
        flops += 2 * npad * npad * n     # Ahat @ h
        k = n
    flops += 2 * gpad * npad * k         # P @ x
    flops += 2 * gpad * k * lpad         # pooled @ W_lin
    cost = pl.CostEstimate(flops=flops,
                           transcendentals=gpad * lpad,
                           bytes_accessed=in_bytes + out_bytes)

    kern = functools.partial(_fused_gcn_kernel,
                             num_layers=num_layers, labels_num=labels_num)
    return pl.pallas_call(
        kern,
        out_shape=jax.ShapeDtypeStruct((gpad, lpad), jnp.float32),
        in_specs=in_specs,
        out_specs=out_specs,
        scratch_shapes=[pltpu.VMEM((npad, npad), jnp.bfloat16),
                        pltpu.SemaphoreType.DMA],
        compiler_params=pltpu.CompilerParams(vmem_limit_bytes=vmem_limit),
        cost_estimate=cost,
    )(*inputs)


# ---------------------------------------------------------------------------
# Glue: GCN normalization, padding, pooling matrix, parameter init, forward
# ---------------------------------------------------------------------------

def _round_up(v, m):
    return ((v + m - 1) // m) * m


def _pad2(a, rows, cols, dtype):
    out = jnp.zeros((rows, cols), dtype)
    return out.at[:a.shape[0], :a.shape[1]].set(a.astype(dtype))


def build_ahat_padded(edge_index, num_nodes, npad):
    """D^-1/2 (A+I) D^-1/2, built directly at padded size, cast to bf16.

    Padded rows/cols have degree 0 -> dinv 0 -> exact zero rows/cols (inert)."""
    src, dst = edge_index[0], edge_index[1]
    loops = jnp.arange(num_nodes, dtype=src.dtype)
    src = jnp.concatenate([src, loops])
    dst = jnp.concatenate([dst, loops])
    # out[dst] aggregates messages from src -> Ahat[dst, src]
    a = jnp.zeros((npad, npad), jnp.float32).at[dst, src].add(1.0)
    deg = a.sum(axis=1)
    dinv = jnp.where(deg > 0, jax.lax.rsqrt(deg), 0.0)
    return (dinv[:, None] * a * dinv[None, :]).astype(jnp.bfloat16)


def init_params(key, features_num, hidden, labels_num):
    dims = [
        (features_num, hidden),
        (hidden, hidden),
        (hidden, hidden),
        (hidden, hidden // 2),
        (hidden // 2, hidden // 2),
        (hidden // 2, hidden // 4),
    ]
    convs = []
    for (fan_in, fan_out) in dims:
        key, kw, kb = jax.random.split(key, 3)
        w = jax.random.normal(kw, (fan_in, fan_out), jnp.float32) / jnp.sqrt(float(fan_in))
        b = jax.random.normal(kb, (1, fan_out), jnp.float32) * 0.01
        convs.append((w, b))
    key, kw, kb = jax.random.split(key, 3)
    w_lin = jax.random.normal(kw, (hidden // 4, labels_num), jnp.float32) / jnp.sqrt(
        float(hidden // 4))
    b_lin = jax.random.normal(kb, (1, labels_num), jnp.float32) * 0.01
    return convs, (w_lin, b_lin)


def gcn_forward(x, edge_index, batch, primary_idxs_in_batch, convs, lin_params,
                num_graphs):
    num_nodes, features_num = x.shape
    w_lin, b_lin = lin_params
    labels_num = w_lin.shape[1]

    # --- per-layer padded widths (feature dim no longer forces a global pad) --
    fpad = _round_up(features_num, 128)
    out_pads = [_round_up(w.shape[1], 128) for (w, _) in convs]   # layer out widths
    in_pads = [fpad] + out_pads[:-1]                              # layer in widths
    lpad = _round_up(labels_num, 128)
    npad = _round_up(max(num_nodes, 8), 128)

    # dense normalized adjacency, built at padded size, bf16 (dominant traffic)
    ahat_p = build_ahat_padded(edge_index, num_nodes, npad)

    # node features padded to [Np, Fpad], bf16 (accumulation stays f32 in-kernel)
    x_p = _pad2(x, npad, fpad, jnp.bfloat16)

    # per-layer zero-padded conv weights (bf16) and biases (f32)
    ws = [_pad2(w, in_pads[i], out_pads[i], jnp.bfloat16)
          for i, (w, _) in enumerate(convs)]
    bs = [_pad2(b, 1, out_pads[i], jnp.float32)
          for i, (_, b) in enumerate(convs)]

    # head params
    wl_p = _pad2(w_lin, out_pads[-1], lpad, jnp.bfloat16)
    bl_p = _pad2(b_lin, 1, lpad, jnp.float32)

    # pooling matrix P (G x N): primary-row selection or per-graph mean pool
    if primary_idxs_in_batch is not None and len(primary_idxs_in_batch) > 0:
        idxs = jnp.asarray(primary_idxs_in_batch, dtype=jnp.int32)
        g = int(idxs.shape[0])
        pool = jax.nn.one_hot(idxs, num_nodes, dtype=jnp.float32)
    else:
        g = num_graphs
        onehot = jax.nn.one_hot(batch, num_graphs, dtype=jnp.float32).T   # (G, N)
        counts = jnp.maximum(onehot.sum(axis=1, keepdims=True), 1.0)
        pool = onehot / counts
    gpad = _round_up(max(g, 1), 16)            # bf16 sublane packing = 16
    pool_p = _pad2(pool, gpad, npad, jnp.bfloat16)

    lsm_pad = fused_gcn(ahat_p, x_p, ws, bs, pool_p, wl_p, bl_p, labels_num)

    log_sm = lsm_pad[:g, :labels_num]
    sm = jnp.exp(log_sm)                 # softmax derived from log-softmax
    return log_sm, sm


# ---------------------------------------------------------------------------
# Example run
# ---------------------------------------------------------------------------

if __name__ == "__main__":
    features_num = 8
    hidden_channels = 32
    labels_num = 4
    num_nodes = 16
    num_graphs = 2

    key = jax.random.PRNGKey(0)
    key, kx, kp = jax.random.split(key, 3)

    # node features [N, F]
    x = jax.random.normal(kx, (num_nodes, features_num), jnp.float32)

    # two 8-node ring graphs (both edge directions)
    src_list, dst_list = [], []
    for gidx in range(num_graphs):
        base = gidx * 8
        for i in range(8):
            a = base + i
            b = base + (i + 1) % 8
            src_list += [a, b]
            dst_list += [b, a]
    edge_index = jnp.array([src_list, dst_list], dtype=jnp.int32)  # (2, E)

    batch = jnp.array([0] * 8 + [1] * 8, dtype=jnp.int32)
    primary_idxs_in_batch = []  # empty -> global_mean_pool branch

    convs, lin_params = init_params(kp, features_num, hidden_channels, labels_num)

    log_sm, sm = gcn_forward(x, edge_index, batch, primary_idxs_in_batch,
                             convs, lin_params, num_graphs)
    jax.block_until_ready((log_sm, sm))

    assert log_sm.shape == (num_graphs, labels_num)
    assert sm.shape == (num_graphs, labels_num)
    assert bool(jnp.all(jnp.isfinite(log_sm)))
    assert bool(jnp.allclose(sm.sum(axis=1), 1.0, atol=1e-3))
    print("KERNEL_OK")
</pallas_src>

<mosaic_0001>
module attributes {stable_mosaic.version = 11 : i64} {
  func.func @_fused_gcn_kernel(%arg0: memref<128x128xbf16, #tpu.memory_space<any>>, %arg1: memref<128x128xbf16, #tpu.memory_space<vmem>>, %arg2: memref<128x128xbf16, #tpu.memory_space<vmem>>, %arg3: memref<128x128xbf16, #tpu.memory_space<vmem>>, %arg4: memref<128x128xbf16, #tpu.memory_space<vmem>>, %arg5: memref<128x128xbf16, #tpu.memory_space<vmem>>, %arg6: memref<128x128xbf16, #tpu.memory_space<vmem>>, %arg7: memref<128x128xbf16, #tpu.memory_space<vmem>>, %arg8: memref<1x128xf32, #tpu.memory_space<vmem>>, %arg9: memref<1x128xf32, #tpu.memory_space<vmem>>, %arg10: memref<1x128xf32, #tpu.memory_space<vmem>>, %arg11: memref<1x128xf32, #tpu.memory_space<vmem>>, %arg12: memref<1x128xf32, #tpu.memory_space<vmem>>, %arg13: memref<1x128xf32, #tpu.memory_space<vmem>>, %arg14: memref<16x128xbf16, #tpu.memory_space<vmem>>, %arg15: memref<128x128xbf16, #tpu.memory_space<vmem>>, %arg16: memref<1x128xf32, #tpu.memory_space<vmem>>, %arg17: memref<16x128xf32, #tpu.memory_space<vmem>>, %arg18: memref<128x128xbf16, #tpu.memory_space<vmem>>, %arg19: memref<!tpu.dma_semaphore, #tpu.memory_space<semaphore_mem>>) attributes {dimension_semantics = [], scalar_prefetch = 0 : i64, scratch_operands = 2 : i64, tpu.core_type = #tpu.core_type<tc>} {
    tpu.enqueue_dma source(%arg0 : memref<128x128xbf16, #tpu.memory_space<any>>) target(%arg18 : memref<128x128xbf16, #tpu.memory_space<vmem>>) target_semaphore(%arg19 : memref<!tpu.dma_semaphore, #tpu.memory_space<semaphore_mem>>)
    %c0 = arith.constant 0 : index
    %c0_0 = arith.constant 0 : index
    %0 = vector.load %arg1[%c0, %c0_0] : memref<128x128xbf16, #tpu.memory_space<vmem>>, vector<128x128xbf16>
    %c0_1 = arith.constant 0 : index
    %c0_2 = arith.constant 0 : index
    %1 = vector.load %arg2[%c0_1, %c0_2] : memref<128x128xbf16, #tpu.memory_space<vmem>>, vector<128x128xbf16>
    %cst = arith.constant dense<0.000000e+00> : vector<128x128xf32>
    %2 = tpu.matmul %0, %1, %cst {dimension_numbers = #tpu.dot_dimension_numbers<[1], [0], [0], [1], [0, 0, 1, 1], [], []>} : vector<128x128xbf16>, vector<128x128xbf16>, vector<128x128xf32> -> vector<128x128xf32>
    tpu.wait_dma2 semaphore(%arg19 : memref<!tpu.dma_semaphore, #tpu.memory_space<semaphore_mem>>) src(%arg0 : memref<128x128xbf16, #tpu.memory_space<any>>) dst(%arg18 : memref<128x128xbf16, #tpu.memory_space<vmem>>)
    %c0_3 = arith.constant 0 : index
    %c0_4 = arith.constant 0 : index
    %3 = vector.load %arg18[%c0_3, %c0_4] : memref<128x128xbf16, #tpu.memory_space<vmem>>, vector<128x128xbf16>
    %4 = arith.truncf %2 : vector<128x128xf32> to vector<128x128xbf16>
    %cst_5 = arith.constant dense<0.000000e+00> : vector<128x128xf32>
    %5 = tpu.matmul %3, %4, %cst_5 {dimension_numbers = #tpu.dot_dimension_numbers<[1], [0], [0], [1], [0, 0, 1, 1], [], []>} : vector<128x128xbf16>, vector<128x128xbf16>, vector<128x128xf32> -> vector<128x128xf32>
    %c0_6 = arith.constant 0 : index
    %c0_7 = arith.constant 0 : index
    %6 = vector.load %arg8[%c0_6, %c0_7] : memref<1x128xf32, #tpu.memory_space<vmem>>, vector<1x128xf32>
    %7 = vector.broadcast %6 : vector<1x128xf32> to vector<128x128xf32>
    %8 = arith.addf %5, %7 : vector<128x128xf32>
    %cst_8 = arith.constant 0.000000e+00 : f32
    %9 = vector.broadcast %cst_8 : f32 to vector<128x128xf32>
    %10 = arith.maximumf %8, %9 : vector<128x128xf32>
    %11 = arith.truncf %10 : vector<128x128xf32> to vector<128x128xbf16>
    %c0_9 = arith.constant 0 : index
    %c0_10 = arith.constant 0 : index
    %12 = vector.load %arg3[%c0_9, %c0_10] : memref<128x128xbf16, #tpu.memory_space<vmem>>, vector<128x128xbf16>
    %cst_11 = arith.constant dense<0.000000e+00> : vector<128x128xf32>
    %13 = tpu.matmul %11, %12, %cst_11 {dimension_numbers = #tpu.dot_dimension_numbers<[1], [0], [0], [1], [0, 0, 1, 1], [], []>} : vector<128x128xbf16>, vector<128x128xbf16>, vector<128x128xf32> -> vector<128x128xf32>
    %c0_12 = arith.constant 0 : index
    %c0_13 = arith.constant 0 : index
    %14 = vector.load %arg18[%c0_12, %c0_13] : memref<128x128xbf16, #tpu.memory_space<vmem>>, vector<128x128xbf16>
    %15 = arith.truncf %13 : vector<128x128xf32> to vector<128x128xbf16>
    %cst_14 = arith.constant dense<0.000000e+00> : vector<128x128xf32>
    %16 = tpu.matmul %14, %15, %cst_14 {dimension_numbers = #tpu.dot_dimension_numbers<[1], [0], [0], [1], [0, 0, 1, 1], [], []>} : vector<128x128xbf16>, vector<128x128xbf16>, vector<128x128xf32> -> vector<128x128xf32>
    %c0_15 = arith.constant 0 : index
    %c0_16 = arith.constant 0 : index
    %17 = vector.load %arg9[%c0_15, %c0_16] : memref<1x128xf32, #tpu.memory_space<vmem>>, vector<1x128xf32>
    %18 = vector.broadcast %17 : vector<1x128xf32> to vector<128x128xf32>
    %19 = arith.addf %16, %18 : vector<128x128xf32>
    %cst_17 = arith.constant 0.000000e+00 : f32
    %20 = vector.broadcast %cst_17 : f32 to vector<128x128xf32>
    %21 = arith.maximumf %19, %20 : vector<128x128xf32>
    %22 = arith.truncf %21 : vector<128x128xf32> to vector<128x128xbf16>
    %c0_18 = arith.constant 0 : index
    %c0_19 = arith.constant 0 : index
    %23 = vector.load %arg4[%c0_18, %c0_19] : memref<128x128xbf16, #tpu.memory_space<vmem>>, vector<128x128xbf16>
    %cst_20 = arith.constant dense<0.000000e+00> : vector<128x128xf32>
    %24 = tpu.matmul %22, %23, %cst_20 {dimension_numbers = #tpu.dot_dimension_numbers<[1], [0], [0], [1], [0, 0, 1, 1], [], []>} : vector<128x128xbf16>, vector<128x128xbf16>, vector<128x128xf32> -> vector<128x128xf32>
    %c0_21 = arith.constant 0 : index
    %c0_22 = arith.constant 0 : index
    %25 = vector.load %arg18[%c0_21, %c0_22] : memref<128x128xbf16, #tpu.memory_space<vmem>>, vector<128x128xbf16>
    %26 = arith.truncf %24 : vector<128x128xf32> to vector<128x128xbf16>
    %cst_23 = arith.constant dense<0.000000e+00> : vector<128x128xf32>
    %27 = tpu.matmul %25, %26, %cst_23 {dimension_numbers = #tpu.dot_dimension_numbers<[1], [0], [0], [1], [0, 0, 1, 1], [], []>} : vector<128x128xbf16>, vector<128x128xbf16>, vector<128x128xf32> -> vector<128x128xf32>
    %c0_24 = arith.constant 0 : index
    %c0_25 = arith.constant 0 : index
    %28 = vector.load %arg10[%c0_24, %c0_25] : memref<1x128xf32, #tpu.memory_space<vmem>>, vector<1x128xf32>
    %29 = vector.broadcast %28 : vector<1x128xf32> to vector<128x128xf32>
    %30 = arith.addf %27, %29 : vector<128x128xf32>
    %cst_26 = arith.constant 0.000000e+00 : f32
    %31 = vector.broadcast %cst_26 : f32 to vector<128x128xf32>
    %32 = arith.maximumf %30, %31 : vector<128x128xf32>
    %33 = arith.truncf %32 : vector<128x128xf32> to vector<128x128xbf16>
    %c0_27 = arith.constant 0 : index
    %c0_28 = arith.constant 0 : index
    %34 = vector.load %arg5[%c0_27, %c0_28] : memref<128x128xbf16, #tpu.memory_space<vmem>>, vector<128x128xbf16>
    %cst_29 = arith.constant dense<0.000000e+00> : vector<128x128xf32>
    %35 = tpu.matmul %33, %34, %cst_29 {dimension_numbers = #tpu.dot_dimension_numbers<[1], [0], [0], [1], [0, 0, 1, 1], [], []>} : vector<128x128xbf16>, vector<128x128xbf16>, vector<128x128xf32> -> vector<128x128xf32>
    %c0_30 = arith.constant 0 : index
    %c0_31 = arith.constant 0 : index
    %36 = vector.load %arg18[%c0_30, %c0_31] : memref<128x128xbf16, #tpu.memory_space<vmem>>, vector<128x128xbf16>
    %37 = arith.truncf %35 : vector<128x128xf32> to vector<128x128xbf16>
    %cst_32 = arith.constant dense<0.000000e+00> : vector<128x128xf32>
    %38 = tpu.matmul %36, %37, %cst_32 {dimension_numbers = #tpu.dot_dimension_numbers<[1], [0], [0], [1], [0, 0, 1, 1], [], []>} : vector<128x128xbf16>, vector<128x128xbf16>, vector<128x128xf32> -> vector<128x128xf32>
    %c0_33 = arith.constant 0 : index
    %c0_34 = arith.constant 0 : index
    %39 = vector.load %arg11[%c0_33, %c0_34] : memref<1x128xf32, #tpu.memory_space<vmem>>, vector<1x128xf32>
    %40 = vector.broadcast %39 : vector<1x128xf32> to vector<128x128xf32>
    %41 = arith.addf %38, %40 : vector<128x128xf32>
    %cst_35 = arith.constant 0.000000e+00 : f32
    %42 = vector.broadcast %cst_35 : f32 to vector<128x128xf32>
    %43 = arith.maximumf %41, %42 : vector<128x128xf32>
    %44 = arith.truncf %43 : vector<128x128xf32> to vector<128x128xbf16>
    %c0_36 = arith.constant 0 : index
    %c0_37 = arith.constant 0 : index
    %45 = vector.load %arg6[%c0_36, %c0_37] : memref<128x128xbf16, #tpu.memory_space<vmem>>, vector<128x128xbf16>
    %cst_38 = arith.constant dense<0.000000e+00> : vector<128x128xf32>
    %46 = tpu.matmul %44, %45, %cst_38 {dimension_numbers = #tpu.dot_dimension_numbers<[1], [0], [0], [1], [0, 0, 1, 1], [], []>} : vector<128x128xbf16>, vector<128x128xbf16>, vector<128x128xf32> -> vector<128x128xf32>
    %c0_39 = arith.constant 0 : index
    %c0_40 = arith.constant 0 : index
    %47 = vector.load %arg18[%c0_39, %c0_40] : memref<128x128xbf16, #tpu.memory_space<vmem>>, vector<128x128xbf16>
    %48 = arith.truncf %46 : vector<128x128xf32> to vector<128x128xbf16>
    %cst_41 = arith.constant dense<0.000000e+00> : vector<128x128xf32>
    %49 = tpu.matmul %47, %48, %cst_41 {dimension_numbers = #tpu.dot_dimension_numbers<[1], [0], [0], [1], [0, 0, 1, 1], [], []>} : vector<128x128xbf16>, vector<128x128xbf16>, vector<128x128xf32> -> vector<128x128xf32>
    %c0_42 = arith.constant 0 : index
    %c0_43 = arith.constant 0 : index
    %50 = vector.load %arg12[%c0_42, %c0_43] : memref<1x128xf32, #tpu.memory_space<vmem>>, vector<1x128xf32>
    %51 = vector.broadcast %50 : vector<1x128xf32> to vector<128x128xf32>
    %52 = arith.addf %49, %51 : vector<128x128xf32>
    %cst_44 = arith.constant 0.000000e+00 : f32
    %53 = vector.broadcast %cst_44 : f32 to vector<128x128xf32>
    %54 = arith.maximumf %52, %53 : vector<128x128xf32>
    %55 = arith.truncf %54 : vector<128x128xf32> to vector<128x128xbf16>
    %c0_45 = arith.constant 0 : index
    %c0_46 = arith.constant 0 : index
    %56 = vector.load %arg7[%c0_45, %c0_46] : memref<128x128xbf16, #tpu.memory_space<vmem>>, vector<128x128xbf16>
    %cst_47 = arith.constant dense<0.000000e+00> : vector<128x128xf32>
    %57 = tpu.matmul %55, %56, %cst_47 {dimension_numbers = #tpu.dot_dimension_numbers<[1], [0], [0], [1], [0, 0, 1, 1], [], []>} : vector<128x128xbf16>, vector<128x128xbf16>, vector<128x128xf32> -> vector<128x128xf32>
    %c0_48 = arith.constant 0 : index
    %c0_49 = arith.constant 0 : index
    %58 = vector.load %arg18[%c0_48, %c0_49] : memref<128x128xbf16, #tpu.memory_space<vmem>>, vector<128x128xbf16>
    %59 = arith.truncf %57 : vector<128x128xf32> to vector<128x128xbf16>
    %cst_50 = arith.constant dense<0.000000e+00> : vector<128x128xf32>
    %60 = tpu.matmul %58, %59, %cst_50 {dimension_numbers = #tpu.dot_dimension_numbers<[1], [0], [0], [1], [0, 0, 1, 1], [], []>} : vector<128x128xbf16>, vector<128x128xbf16>, vector<128x128xf32> -> vector<128x128xf32>
    %c0_51 = arith.constant 0 : index
    %c0_52 = arith.constant 0 : index
    %61 = vector.load %arg13[%c0_51, %c0_52] : memref<1x128xf32, #tpu.memory_space<vmem>>, vector<1x128xf32>
    %62 = vector.broadcast %61 : vector<1x128xf32> to vector<128x128xf32>
    %63 = arith.addf %60, %62 : vector<128x128xf32>
    %64 = arith.truncf %63 : vector<128x128xf32> to vector<128x128xbf16>
    %c0_53 = arith.constant 0 : index
    %c0_54 = arith.constant 0 : index
    %65 = vector.load %arg14[%c0_53, %c0_54] : memref<16x128xbf16, #tpu.memory_space<vmem>>, vector<16x128xbf16>
    %cst_55 = arith.constant dense<0.000000e+00> : vector<16x128xf32>
    %66 = tpu.matmul %65, %64, %cst_55 {dimension_numbers = #tpu.dot_dimension_numbers<[1], [0], [0], [1], [0, 0, 1, 1], [], []>} : vector<16x128xbf16>, vector<128x128xbf16>, vector<16x128xf32> -> vector<16x128xf32>
    %67 = arith.truncf %66 : vector<16x128xf32> to vector<16x128xbf16>
    %c0_56 = arith.constant 0 : index
    %c0_57 = arith.constant 0 : index
    %68 = vector.load %arg15[%c0_56, %c0_57] : memref<128x128xbf16, #tpu.memory_space<vmem>>, vector<128x128xbf16>
    %cst_58 = arith.constant dense<0.000000e+00> : vector<16x128xf32>
    %69 = tpu.matmul %67, %68, %cst_58 {dimension_numbers = #tpu.dot_dimension_numbers<[1], [0], [0], [1], [0, 0, 1, 1], [], []>} : vector<16x128xbf16>, vector<128x128xbf16>, vector<16x128xf32> -> vector<16x128xf32>
    %c0_59 = arith.constant 0 : index
    %c0_60 = arith.constant 0 : index
    %70 = vector.load %arg16[%c0_59, %c0_60] : memref<1x128xf32, #tpu.memory_space<vmem>>, vector<1x128xf32>
    %71 = vector.broadcast %70 : vector<1x128xf32> to vector<16x128xf32>
    %72 = arith.addf %69, %71 : vector<16x128xf32>
    %73 = tpu.iota {dimensions = array<i32: 1>} : vector<16x128xi32>
    %c4_i32 = arith.constant 4 : i32
    %74 = vector.broadcast %c4_i32 : i32 to vector<16x128xi32>
    %75 = arith.cmpi slt, %73, %74 : vector<16x128xi32>
    %cst_61 = arith.constant -1.000000e+30 : f32
    %76 = vector.broadcast %cst_61 : f32 to vector<16x128xf32>
    %77 = arith.select %75, %72, %76 : vector<16x128xi1>, vector<16x128xf32>
    %cst_62 = arith.constant dense<0xFF800000> : vector<16xf32>
    %78 = vector.multi_reduction <maximumf>, %77, %cst_62 [1] : vector<16x128xf32> to vector<16xf32>
    %79 = vector.shape_cast %78 : vector<16xf32> to vector<16x1xf32>
    %80 = vector.broadcast %79 : vector<16x1xf32> to vector<16x128xf32>
    %81 = arith.subf %77, %80 : vector<16x128xf32>
    %82 = math.exp %81 : vector<16x128xf32>
    %cst_63 = arith.constant dense<0.000000e+00> : vector<16xf32>
    %83 = vector.multi_reduction <add>, %82, %cst_63 [1] : vector<16x128xf32> to vector<16xf32>
    %84 = vector.shape_cast %83 : vector<16xf32> to vector<16x1xf32>
    %85 = math.log %84 : vector<16x1xf32>
    %86 = vector.broadcast %85 : vector<16x1xf32> to vector<16x128xf32>
    %87 = arith.subf %81, %86 : vector<16x128xf32>
    %c0_64 = arith.constant 0 : index
    %c0_65 = arith.constant 0 : index
    %88 = vector.load %arg17[%c0_64, %c0_65] : memref<16x128xf32, #tpu.memory_space<vmem>>, vector<16x128xf32>
    tpu.vector_store %arg17[%c0_64, %c0_65], %87 {strides = array<i32>} : memref<16x128xf32, #tpu.memory_space<vmem>>, vector<16x128xf32>,
    return
  }
}

</mosaic_0001>

<bundles_post_ra>
// kernel: tpu_custom_call.1
= control target key start
LH: loop header
LB: loop body
LE: loop exit
PB: predicated region body
PF: predicated region fallthrough
CT: control target
= control target key end

     0   :  { %s3672_s0 = inlined_call_operand.hbm [shape: bf16[128,128], index: 0, kind: input, shape index: {}]   ;;  %s3673_s1 = inlined_call_operand.hbm [shape: bf16[128,128], index: 1, kind: input, shape index: {}]   ;;  %s3674_s2 = inlined_call_operand.hbm [shape: bf16[128,128], index: 2, kind: input, shape index: {}]   ;;  %s3675_s3 = inlined_call_operand.hbm [shape: bf16[128,128], index: 3, kind: input, shape index: {}]   ;;  %s3676_s4 = inlined_call_operand.hbm [shape: bf16[128,128], index: 4, kind: input, shape index: {}]   ;;  %s3677_s5 = inlined_call_operand.hbm [shape: bf16[128,128], index: 5, kind: input, shape index: {}]   ;;  %s3678_s6 = inlined_call_operand.hbm [shape: bf16[128,128], index: 6, kind: input, shape index: {}]   ;;  %s3679_s7 = inlined_call_operand.hbm [shape: bf16[128,128], index: 7, kind: input, shape index: {}]   ;;  %s3680_s8 = inlined_call_operand.vmem [shape: f32[1,128], index: 8, kind: input, shape index: {}]   ;;  %s3681_s9 = inlined_call_operand.vmem [shape: f32[1,128], index: 9, kind: input, shape index: {}]   ;;  %s3682_s10 = inlined_call_operand.vmem [shape: f32[1,128], index: 10, kind: input, shape index: {}]   ;;  %s3683_s11 = inlined_call_operand.vmem [shape: f32[1,128], index: 11, kind: input, shape index: {}]   ;;  %s3684_s12 = inlined_call_operand.vmem [shape: f32[1,128], index: 12, kind: input, shape index: {}]   ;;  %s3685_s13 = inlined_call_operand.vmem [shape: f32[1,128], index: 13, kind: input, shape index: {}]   ;;  %s3686_s14 = inlined_call_operand.vmem [shape: bf16[16,128], index: 14, kind: input, shape index: {}]   ;;  %s3687_s15 = inlined_call_operand.hbm [shape: bf16[128,128], index: 15, kind: input, shape index: {}]   ;;  %s3688_s16 = inlined_call_operand.vmem [shape: f32[1,128], index: 16, kind: input, shape index: {}]   ;;  %s3689_s17 = inlined_call_operand.hbm [shape: f32[16,128], index: 17, kind: output, shape index: {}]  }
   0x1   :  { %3692 = sst [smem:[#allocation30_spill]] %s3672_s0 }
   0x2   :  { %3693 = sst [smem:[#allocation31_spill]] %s3673_s1 }
   0x3   :  { %22 = vsyncpa [#allocation5], 0 }
   0x4   :  { %23 = vsyncpa [#allocation8], 0 }
   0x5   :  { %24 = vsyncpa [#allocation11], 0 }
   0x6   :  { %25 = vsyncpa [#allocation14], 0 }
   0x7   :  { %26 = vsyncpa [#allocation17], 0 }
   0x8   :  { %27 = vsyncpa [#allocation6], 0  ;;  %s3272_s24 = smov [#allocation7]   ;;  %s3273_s26 = smov [#allocation10]  }
   0x9   :  { %s45_s25 = sshll.u32 %s3272_s24, 4  ;;  %s69_s27 = sshll.u32 %s3273_s26, 4  ;;  %s46_s25 = int_to_ptr.vmem [resolvable:$true] %s45_s25  ;;  %s3378_s27 = int_to_ptr.vmem [resolvable:$true] %s69_s27 }
   0xa   :  { %s3038_s0 = scalar_lea.hbm %s3674_s2, 1024 }
   0xb   :  { %p3039_p0 = scmp.ne.s32.totalorder %s3674_s2, %s3038_s0  ;;  %p3042_p1 = scmp.lt.u32.totalorder %s3038_s0, %s3674_s2 }
   0xd   :  { %p3044_p2 = pnand %p3042_p1, %p3039_p0 }
   0xf   :  { %3047 = shalt.err (!%p3044_p2)
}
  0x10   :  { %s3048_s20 = scalar_lea.vmem %s46_s25, 1024  ;;  %p3053_p4 = scmp.lt.s32.totalorder %s46_s25, %s46_s25 }
  0x11   :  { %p3049_p3 = scmp.ne.s32.totalorder %s46_s25, %s3048_s20  ;;  %p3054_p5 = scmp.lt.s32.totalorder %s3048_s20, %s3048_s20 }
  0x13   :  { %p3055_p6 = por %p3054_p5, %p3053_p4 }
  0x15   :  { %p3056_p7 = pnand %p3055_p6, %p3049_p3 }
  0x17   :  { %3059 = shalt.err (!%p3056_p7)
}
  0x18   :  { %s3274_s21 = smov 64   ;;  %s3275_s22 = smov 4  }
  0x19   :  { %51 = dma.hbm_to_vmem [thread:$0]  %s3674_s2, 1024, %s46_s25, [#allocation8], %s3274_s21, %s3274_s21, %s3275_s22  }
  0x1a   :  { %s3060_s29 = scalar_lea.hbm %s3676_s4, 1024 }
  0x1b   :  { %p3061_p8 = scmp.ne.s32.totalorder %s3676_s4, %s3060_s29  ;;  %p3064_p9 = scmp.lt.u32.totalorder %s3060_s29, %s3676_s4 }
  0x1d   :  { %p3066_p10 = pnand %p3064_p9, %p3061_p8 }
  0x1f   :  { %3069 = shalt.err (!%p3066_p10)
}
  0x20   :  { %s3070_s1 = scalar_lea.vmem %s3378_s27, 1024  ;;  %p3075_p12 = scmp.lt.s32.totalorder %s3378_s27, %s3378_s27 }
  0x21   :  { %p3071_p11 = scmp.ne.s32.totalorder %s3378_s27, %s3070_s1  ;;  %p3076_p13 = scmp.lt.s32.totalorder %s3070_s1, %s3070_s1 }
  0x23   :  { %p3077_p0 = por %p3076_p13, %p3075_p12 }
  0x25   :  { %p3078_p1 = pnand %p3077_p0, %p3071_p11 }
  0x27   :  { %3081 = shalt.err (!%p3078_p1)
}
  0x28   :  { %75 = dma.hbm_to_vmem [thread:$0]  %s3676_s4, 1024, %s3378_s27, [#allocation11], %s3274_s21, %s3274_s21, %s3275_s22  }
  0x29   :  { %s3276_s20 = smov [#allocation13]   ;;  %s3277_s24 = smov [#allocation4]  }
  0x2a   :  { %s93_s23 = sshll.u32 %s3276_s20, 4  ;;  %s33_s26 = sshll.u32 %s3277_s24, 4  ;;  %s94_s23 = int_to_ptr.vmem [resolvable:$true] %s93_s23  ;;  %s3415_s26 = int_to_ptr.vmem [resolvable:$true] %s33_s26 }
  0x2b   :  { %s3082_s0 = scalar_lea.hbm %s3678_s6, 1024 }
  0x2c   :  { %p3083_p2 = scmp.ne.s32.totalorder %s3678_s6, %s3082_s0  ;;  %p3086_p3 = scmp.lt.u32.totalorder %s3082_s0, %s3678_s6 }
  0x2e   :  { %p3088_p4 = pnand %p3086_p3, %p3083_p2 }
  0x30   :  { %3091 = shalt.err (!%p3088_p4)
}
  0x31   :  { %s3092_s4 = scalar_lea.vmem %s94_s23, 1024  ;;  %p3097_p6 = scmp.lt.s32.totalorder %s94_s23, %s94_s23 }
  0x32   :  { %p3093_p5 = scmp.ne.s32.totalorder %s94_s23, %s3092_s4  ;;  %p3098_p7 = scmp.lt.s32.totalorder %s3092_s4, %s3092_s4 }
  0x34   :  { %p3099_p8 = por %p3098_p7, %p3097_p6 }
  0x36   :  { %p3100_p9 = pnand %p3099_p8, %p3093_p5 }
  0x38   :  { %3103 = shalt.err (!%p3100_p9)
}
  0x39   :  { %99 = dma.hbm_to_vmem [thread:$0]  %s3678_s6, 1024, %s94_s23, [#allocation14], %s3274_s21, %s3274_s21, %s3275_s22  }
  0x3a   :  { %s3694_s24 = sld [smem:[#allocation31_spill]] }
  0x40   :  { %s3104_s28 = scalar_lea.hbm %s3694_s24, 1024 }
  0x41   :  { %p3105_p10 = scmp.ne.s32.totalorder %s3694_s24, %s3104_s28  ;;  %p3108_p11 = scmp.lt.u32.totalorder %s3104_s28, %s3694_s24 }
  0x43   :  { %p3110_p12 = pnand %p3108_p11, %p3105_p10 }
  0x45   :  { %3113 = shalt.err (!%p3110_p12)
}
  0x46   :  { %s3114_s19 = scalar_lea.vmem %s3415_s26, 1024  ;;  %p3119_p0 = scmp.lt.s32.totalorder %s3415_s26, %s3415_s26 }
  0x47   :  { %p3115_p13 = scmp.ne.s32.totalorder %s3415_s26, %s3114_s19  ;;  %p3120_p1 = scmp.lt.s32.totalorder %s3114_s19, %s3114_s19 }
  0x49   :  { %p3121_p2 = por %p3120_p1, %p3119_p0 }
  0x4b   :  { %p3122_p3 = pnand %p3121_p2, %p3115_p13 }
  0x4d   :  { %3125 = shalt.err (!%p3122_p3)
}
  0x4e   :  { %39 = dma.hbm_to_vmem [thread:$0]  %s3694_s24, 1024, %s3415_s26, [#allocation5], %s3274_s21, %s3274_s21, %s3275_s22  }
  0x4f   :  { %s3278_s1 = smov [#allocation9]   ;;  %s3279_s27 = smov [#allocation12]  }
  0x50   :  { %s57_s4 = sshll.u32 %s3278_s1, 4  ;;  %s81_s2 = sshll.u32 %s3279_s27, 4  ;;  %s58_s4 = int_to_ptr.vmem [resolvable:$true] %s57_s4  ;;  %s3452_s2 = int_to_ptr.vmem [resolvable:$true] %s81_s2 }
  0x51   :  { %s3126_s28 = scalar_lea.hbm %s3675_s3, 1024 }
  0x52   :  { %p3127_p4 = scmp.ne.s32.totalorder %s3675_s3, %s3126_s28  ;;  %p3130_p5 = scmp.lt.u32.totalorder %s3126_s28, %s3675_s3 }
  0x54   :  { %p3132_p6 = pnand %p3130_p5, %p3127_p4 }
  0x56   :  { %3135 = shalt.err (!%p3132_p6)
}
  0x57   :  { %s3136_s26 = scalar_lea.vmem %s58_s4, 1024  ;;  %p3141_p8 = scmp.lt.s32.totalorder %s58_s4, %s58_s4 }
  0x58   :  { %p3137_p7 = scmp.ne.s32.totalorder %s58_s4, %s3136_s26  ;;  %p3142_p9 = scmp.lt.s32.totalorder %s3136_s26, %s3136_s26 }
  0x5a   :  { %p3143_p10 = por %p3142_p9, %p3141_p8 }
  0x5c   :  { %p3144_p11 = pnand %p3143_p10, %p3137_p7 }
  0x5e   :  { %3147 = shalt.err (!%p3144_p11)
}
  0x5f   :  { %63 = dma.hbm_to_vmem [thread:$0]  %s3675_s3, 1024, %s58_s4, [#allocation8], %s3274_s21, %s3274_s21, %s3275_s22  }
  0x60   :  { %s3148_s1 = scalar_lea.hbm %s3677_s5, 1024 }
  0x61   :  { %p3149_p12 = scmp.ne.s32.totalorder %s3677_s5, %s3148_s1  ;;  %p3152_p13 = scmp.lt.u32.totalorder %s3148_s1, %s3677_s5 }
  0x63   :  { %p3154_p0 = pnand %p3152_p13, %p3149_p12 }
  0x65   :  { %3157 = shalt.err (!%p3154_p0)
}
  0x66   :  { %s3158_s29 = scalar_lea.vmem %s3452_s2, 1024  ;;  %p3163_p2 = scmp.lt.s32.totalorder %s3452_s2, %s3452_s2 }
  0x67   :  { %p3159_p1 = scmp.ne.s32.totalorder %s3452_s2, %s3158_s29  ;;  %p3164_p3 = scmp.lt.s32.totalorder %s3158_s29, %s3158_s29 }
  0x69   :  { %p3165_p4 = por %p3164_p3, %p3163_p2 }
  0x6b   :  { %p3166_p5 = pnand %p3165_p4, %p3159_p1 }
  0x6d   :  { %3169 = shalt.err (!%p3166_p5)
}
  0x6e   :  { %87 = dma.hbm_to_vmem [thread:$0]  %s3677_s5, 1024, %s3452_s2, [#allocation11], %s3274_s21, %s3274_s21, %s3275_s22  }
  0x6f   :  { %s3280_s0 = smov [#allocation15]   ;;  %s3281_s18 = smov [#allocation16]  }
  0x70   :  { %s105_s30 = sshll.u32 %s3280_s0, 4  ;;  %s131_s26 = sshll.u32 %s3281_s18, 4  ;;  %s106_s30 = int_to_ptr.vmem [resolvable:$true] %s105_s30  ;;  %s3489_s26 = int_to_ptr.vmem [resolvable:$true] %s131_s26 }
  0x71   :  { %s3170_s6 = scalar_lea.hbm %s3679_s7, 1024 }
  0x72   :  { %p3171_p6 = scmp.ne.s32.totalorder %s3679_s7, %s3170_s6  ;;  %p3174_p7 = scmp.lt.u32.totalorder %s3170_s6, %s3679_s7 }
  0x74   :  { %p3176_p8 = pnand %p3174_p7, %p3171_p6 }
  0x76   :  { %3179 = shalt.err (!%p3176_p8)
}
  0x77   :  { %s3180_s5 = scalar_lea.vmem %s106_s30, 1024  ;;  %p3185_p10 = scmp.lt.s32.totalorder %s106_s30, %s106_s30 }
  0x78   :  { %p3181_p9 = scmp.ne.s32.totalorder %s106_s30, %s3180_s5  ;;  %p3186_p11 = scmp.lt.s32.totalorder %s3180_s5, %s3180_s5 }
  0x7a   :  { %p3187_p12 = por %p3186_p11, %p3185_p10 }
  0x7c   :  { %p3188_p13 = pnand %p3187_p12, %p3181_p9 }
  0x7e   :  { %3191 = shalt.err (!%p3188_p13)
}
  0x7f   :  { %111 = dma.hbm_to_vmem [thread:$0]  %s3679_s7, 1024, %s106_s30, [#allocation14], %s3274_s21, %s3274_s21, %s3275_s22  }
  0x80   :  { %s3192_s3 = scalar_lea.hbm %s3687_s15, 1024 }
  0x81   :  { %p3193_p0 = scmp.ne.s32.totalorder %s3687_s15, %s3192_s3  ;;  %p3196_p1 = scmp.lt.u32.totalorder %s3192_s3, %s3687_s15 }
  0x83   :  { %p3198_p2 = pnand %p3196_p1, %p3193_p0 }
  0x85   :  { %3201 = shalt.err (!%p3198_p2)
}
  0x86   :  { %s3202_s19 = scalar_lea.vmem %s3489_s26, 1024  ;;  %p3207_p4 = scmp.lt.s32.totalorder %s3489_s26, %s3489_s26 }
  0x87   :  { %p3203_p3 = scmp.ne.s32.totalorder %s3489_s26, %s3202_s19  ;;  %p3208_p5 = scmp.lt.s32.totalorder %s3202_s19, %s3202_s19 }
  0x89   :  { %p3209_p6 = por %p3208_p5, %p3207_p4 }
  0x8b   :  { %p3210_p7 = pnand %p3209_p6, %p3203_p3 }
  0x8d   :  { %3213 = shalt.err (!%p3210_p7)
}
  0x8e   :  { %137 = dma.hbm_to_vmem [thread:$0]  %s3687_s15, 1024, %s3489_s26, [#allocation17], %s3274_s21, %s3274_s21, %s3275_s22  }
  0x8f   :  { %3258 = dma.done.wait [#allocation5], 1024  }
  0x90   :  { %3259 = vsyncadd [#allocation5], 4294966272 }
  0x91   :  { %3260 = dma.done.wait [#allocation8], 2048  }
  0x92   :  { %3261 = vsyncadd [#allocation8], 4294965248 }
  0x93   :  { %3262 = dma.done.wait [#allocation11], 2048  }
  0x94   :  { %3263 = vsyncadd [#allocation11], 4294965248 }
  0x95   :  { %3264 = dma.done.wait [#allocation14], 2048  }
  0x96   :  { %3265 = vsyncadd [#allocation14], 4294965248 }
  0x97   :  { %3266 = dma.done.wait [#allocation17], 1024  }
  0x98   :  { %3267 = vsyncadd [#allocation17], 4294966272  ;;  %v2957_v0 = vld [vmem:[#allocation7] sm:$0xff]   ;;  %v2958_v1 = vld [vmem:[#allocation7 + $0x8] sm:$0xff]   ;;  %s3282_s15 = smov [#allocation2]   ;;  %s3695_s6 = sld [smem:[#allocation30_spill]] }
  0x99   :  { %2517 = vmatprep.subr.bf16.mxu0 %v2957_v0  ;;  %v2959_v2 = vld [vmem:[#allocation7 + $0x10] sm:$0xff]   ;;  %v2960_v3 = vld [vmem:[#allocation7 + $0x18] sm:$0xff]   ;;  %v2965_v4 = vld [vmem:[#allocation4] sm:$0xff]   ;;  %s172_s21 = sshll.u32 %s3282_s15, 4  ;;  %s173_s21 = int_to_ptr.vmem [resolvable:$true] %s172_s21 }
  0x9a   :  { %2518 = vmatpush3.bf16.msra.mxu0 %v2957_v0  ;;  %2533 = vmatprep.mubr.bf16.mxu0 %v2965_v4  ;;  %v2961_v5 = vld [vmem:[#allocation7 + $0x20] sm:$0xff]   ;;  %v2962_v6 = vld [vmem:[#allocation7 + $0x28] sm:$0xff]   ;;  %v2963_v7 = vld [vmem:[#allocation7 + $0x30] sm:$0xff]  }
  0x9b   :  { %2519 = vmatprep.subr.bf16.mxu0 %v2958_v1  ;;  %v2964_v8 = vld [vmem:[#allocation7 + $0x38] sm:$0xff]   ;;  %v2966_v9 = vld [vmem:[#allocation4 + $0x8] sm:$0xff]   ;;  %v2967_v10 = vld [vmem:[#allocation4 + $0x10] sm:$0xff]  }
  0x9c   :  { %v2968_v11 = vld [vmem:[#allocation4 + $0x18] sm:$0xff]   ;;  %v2969_v12 = vld [vmem:[#allocation4 + $0x20] sm:$0xff]   ;;  %v2970_v13 = vld [vmem:[#allocation4 + $0x28] sm:$0xff]  }
  0x9d   :  { %v2971_v14 = vld [vmem:[#allocation4 + $0x30] sm:$0xff]   ;;  %v2972_v15 = vld [vmem:[#allocation4 + $0x38] sm:$0xff]  }
  0x9e   :  { %2520 = vmatpush3.bf16.msra.mxu0 %v2958_v1  ;;  %s3214_s23 = scalar_lea.hbm %s3695_s6, 1024 }
  0x9f   :  { %2521 = vmatprep.subr.bf16.mxu0 %v2959_v2  ;;  %p3215_p8 = scmp.ne.s32.totalorder %s3695_s6, %s3214_s23  ;;  %p3218_p9 = scmp.lt.u32.totalorder %s3214_s23, %s3695_s6 }
  0xa1   :  { %p3220_p10 = pnand %p3218_p9, %p3215_p8 }
  0xa2   :  { %2522 = vmatpush3.bf16.msra.mxu0 %v2959_v2 }
  0xa3   :  { %2523 = vmatprep.subr.bf16.mxu0 %v2960_v3 }
  0xa6   :  { %2524 = vmatpush3.bf16.msra.mxu0 %v2960_v3 }
  0xa7   :  { %2525 = vmatprep.subr.bf16.mxu0 %v2961_v5 }
  0xaa   :  { %2526 = vmatpush3.bf16.msra.mxu0 %v2961_v5 }
  0xab   :  { %2527 = vmatprep.subr.bf16.mxu0 %v2962_v6 }
  0xae   :  { %2528 = vmatpush3.bf16.msra.mxu0 %v2962_v6 }
  0xaf   :  { %2529 = vmatprep.subr.bf16.mxu0 %v2963_v7 }
  0xb2   :  { %2530 = vmatpush3.bf16.msra.mxu0 %v2963_v7 }
  0xb3   :  { %2531 = vmatprep.subr.bf16.mxu0 %v2964_v8 }
  0xb6   :  { %2532 = vmatpush3.bf16.msra.mxu0 %v2964_v8 }
  0xb9   :  { %2534 = vmatmul.mubr.bf16.vlgmr.msra.gmra.mrb[0].mxu0 %v2966_v9 }
  0xba   :  { %2537 = vmatprep.mubr.bf16.mxu0 %v2967_v10 }
  0xc1   :  { %2538 = vmatmul.mubr.bf16.gmra.mrb[4].mxu0 %v2968_v11 }
  0xc2   :  { %2541 = vmatprep.mubr.bf16.mxu0 %v2969_v12 }
  0xc9   :  { %2542 = vmatmul.mubr.bf16.gmra.mrb[8].mxu0 %v2970_v13 }
  0xca   :  { %2545 = vmatprep.mubr.bf16.mxu0 %v2971_v14 }
  0xd1   :  { %2546 = vmatmul.mubr.bf16.gmra.mrb[12].mxu0 %v2972_v15 }
  0xd2   :  { %3223 = shalt.err (!%p3220_p10)  }
  0xd3   :  { %s3224_s2 = scalar_lea.vmem %s173_s21, 1024  ;;  %p3229_p12 = scmp.lt.s32.totalorder %s173_s21, %s173_s21 }
  0xd4   :  { %p3225_p11 = scmp.ne.s32.totalorder %s173_s21, %s3224_s2  ;;  %p3230_p13 = scmp.lt.s32.totalorder %s3224_s2, %s3224_s2 }
  0xd6   :  { %p3231_p0 = por %p3230_p13, %p3229_p12 }
  0xd8   :  { %p3232_p1 = pnand %p3231_p0, %p3225_p11 }
  0xda   :  { %3235 = shalt.err (!%p3232_p1)  }
  0xdb   :  { %175 = dma.hbm_to_vmem [thread:$0]  %s3695_s6, 1024, %s173_s21, [#allocation3] }
 0x18c   :  { %v2535_v16 = vpop.f32.mrb[0].mxu0 }
 0x18d   :  { %v338_v17 = vpop.f32.mrb[1].mxu0 }
 0x18e   :  { %v2536_v18 = vpop.f32.mrb[2].mxu0 }
 0x18f   :  { %v341_v19 = vpop.f32.mrb[3].mxu0  ;;  %v414_v33 = vpack.c.bf16 %v2536_v18, %v2535_v16 }
 0x190   :  { %v413_v32 = vpack.c.bf16 %v341_v19, %v338_v17 }
 0x194   :  { %v2539_v20 = vpop.f32.mrb[4].mxu0 }
 0x195   :  { %v354_v21 = vpop.f32.mrb[5].mxu0 }
 0x196   :  { %v2540_v22 = vpop.f32.mrb[6].mxu0 }
 0x197   :  { %v357_v23 = vpop.f32.mrb[7].mxu0 }
 0x19c   :  { %v2543_v24 = vpop.f32.mrb[8].mxu0 }
 0x19d   :  { %v370_v25 = vpop.f32.mrb[9].mxu0 }
 0x19e   :  { %v2544_v26 = vpop.f32.mrb[10].mxu0 }
 0x19f   :  { %v373_v27 = vpop.f32.mrb[11].mxu0 }
 0x1a4   :  { %v2547_v28 = vpop.f32.mrb[12].mxu0 }
 0x1a5   :  { %v386_v29 = vpop.f32.mrb[13].mxu0 }
 0x1a6   :  { %v2548_v30 = vpop.f32.mrb[14].mxu0 }
 0x1a7   :  { %v389_v31 = vpop.f32.mrb[15].mxu0 }
 0x1a8   :  { %3268 = dma.done.wait [#allocation3], 1024 }
 0x1a9   :  { %3269 = vsyncadd [#allocation3], 4294966272  ;;  %2549 = vmatprep.subr.bf16.mxu1 %v413_v32  ;;  %v415_v34 = vpack.c.bf16 %v357_v23, %v354_v21  ;;  %v3538_v35 = vld [vmem:[#allocation2] sm:$0xff]  ;;  %v416_v36 = vpack.c.bf16 %v2540_v22, %v2539_v20  ;;  %v2974_v38 = vld [vmem:[#allocation9 + $0x8] sm:$0xff]   ;;  %v417_v39 = vpack.c.bf16 %v373_v27, %v370_v25  ;;  %v418_v41 = vpack.c.bf16 %v2544_v26, %v2543_v24 }
 0x1aa   :  { %2550 = vmatpush3.bf16.msra.mxu1 %v413_v32  ;;  %2565 = vmatprep.mubr.bf16.mxu1 %v3538_v35  ;;  %v2973_v37 = vld [vmem:[#allocation9] sm:$0xff]   ;;  %v2975_v40 = vld [vmem:[#allocation9 + $0x10] sm:$0xff]   ;;  %v2976_v42 = vld [vmem:[#allocation9 + $0x18] sm:$0xff]   ;;  %v419_v43 = vpack.c.bf16 %v389_v31, %v386_v29  ;;  %v420_v45 = vpack.c.bf16 %v2548_v30, %v2547_v28  ;;  %vm3284_vm0 = vmmov 0  }
 0x1ab   :  { %2551 = vmatprep.subr.bf16.mxu1 %v414_v33  ;;  %2581 = vmatprep.subr.bf16.mxu0 %v2973_v37  ;;  %v2977_v44 = vld [vmem:[#allocation9 + $0x20] sm:$0xff]   ;;  %v2978_v46 = vld [vmem:[#allocation9 + $0x28] sm:$0xff]   ;;  %v3543_v48 = vld [vmem:[#allocation2 + $0x10] sm:$0xff] }
 0x1ac   :  { %2582 = vmatpush3.bf16.msra.mxu0 %v2973_v37  ;;  %v3541_v47 = vld [vmem:[#allocation2 + $0x8] sm:$0xff]  ;;  %v3547_v49 = vld [vmem:[#allocation2 + $0x18] sm:$0xff]  ;;  %v3549_v50 = vld [vmem:[#allocation2 + $0x20] sm:$0xff] }
 0x1ad   :  { %2583 = vmatprep.subr.bf16.mxu0 %v2974_v38  ;;  %v3553_v51 = vld [vmem:[#allocation2 + $0x28] sm:$0xff]  ;;  %v3555_v52 = vld [vmem:[#allocation2 + $0x30] sm:$0xff]  ;;  %v3559_v53 = vld [vmem:[#allocation2 + $0x38] sm:$0xff] }
 0x1ae   :  { %2552 = vmatpush3.bf16.msra.mxu1 %v414_v33  ;;  %v2979_v54 = vld [vmem:[#allocation9 + $0x30] sm:$0xff]   ;;  %v2980_v55 = vld [vmem:[#allocation9 + $0x38] sm:$0xff]   ;;  %v2250_v56 = vld [vmem:[%s3680_s8] ss:$0 sm:$0xff] }
 0x1af   :  { %2553 = vmatprep.subr.bf16.mxu1 %v415_v34 }
 0x1b0   :  { %2584 = vmatpush3.bf16.msra.mxu0 %v2974_v38 }
 0x1b1   :  { %2585 = vmatprep.subr.bf16.mxu0 %v2975_v40 }
 0x1b2   :  { %2554 = vmatpush3.bf16.msra.mxu1 %v415_v34 }
 0x1b3   :  { %2555 = vmatprep.subr.bf16.mxu1 %v416_v36 }
 0x1b4   :  { %2586 = vmatpush3.bf16.msra.mxu0 %v2975_v40 }
 0x1b5   :  { %2587 = vmatprep.subr.bf16.mxu0 %v2976_v42 }
 0x1b6   :  { %2556 = vmatpush3.bf16.msra.mxu1 %v416_v36 }
 0x1b7   :  { %2557 = vmatprep.subr.bf16.mxu1 %v417_v39 }
 0x1b8   :  { %2588 = vmatpush3.bf16.msra.mxu0 %v2976_v42 }
 0x1b9   :  { %2589 = vmatprep.subr.bf16.mxu0 %v2977_v44 }
 0x1ba   :  { %2558 = vmatpush3.bf16.msra.mxu1 %v417_v39 }
 0x1bb   :  { %2559 = vmatprep.subr.bf16.mxu1 %v418_v41 }
 0x1bc   :  { %2590 = vmatpush3.bf16.msra.mxu0 %v2977_v44 }
 0x1bd   :  { %2591 = vmatprep.subr.bf16.mxu0 %v2978_v46 }
 0x1be   :  { %2560 = vmatpush3.bf16.msra.mxu1 %v418_v41 }
 0x1bf   :  { %2561 = vmatprep.subr.bf16.mxu1 %v419_v43 }
 0x1c0   :  { %2592 = vmatpush3.bf16.msra.mxu0 %v2978_v46 }
 0x1c1   :  { %2593 = vmatprep.subr.bf16.mxu0 %v2979_v54 }
 0x1c2   :  { %2562 = vmatpush3.bf16.msra.mxu1 %v419_v43 }
 0x1c3   :  { %2563 = vmatprep.subr.bf16.mxu1 %v420_v45 }
 0x1c4   :  { %2594 = vmatpush3.bf16.msra.mxu0 %v2979_v54 }
 0x1c5   :  { %2595 = vmatprep.subr.bf16.mxu0 %v2980_v55 }
 0x1c6   :  { %2564 = vmatpush3.bf16.msra.mxu1 %v420_v45 }
 0x1c8   :  { %2596 = vmatpush3.bf16.msra.mxu0 %v2980_v55 }
 0x1c9   :  { %2566 = vmatmul.mubr.bf16.vlgmr.msra.gmra.mrb[0].mxu1 %v3541_v47 }
 0x1ca   :  { %2569 = vmatprep.mubr.bf16.mxu1 %v3543_v48 }
 0x1d1   :  { %2570 = vmatmul.mubr.bf16.gmra.mrb[4].mxu1 %v3547_v49 }
 0x1d2   :  { %2573 = vmatprep.mubr.bf16.mxu1 %v3549_v50 }
 0x1d9   :  { %2574 = vmatmul.mubr.bf16.gmra.mrb[8].mxu1 %v3553_v51 }
 0x1da   :  { %2577 = vmatprep.mubr.bf16.mxu1 %v3555_v52 }
 0x1e1   :  { %2578 = vmatmul.mubr.bf16.gmra.mrb[12].mxu1 %v3559_v53 }
 0x1e2   :  { %2629 = vmatprep.mubr.bf16.mxu1 %v3538_v35 }
 0x29c   :  { %v2567_v57 = vpop.f32.mrb[0].mxu1 }
 0x29d   :  { %v471_v58 = vadd.f32 %v2567_v57, %v2250_v56  ;;  %v462_v59 = vpop.f32.mrb[1].mxu1 }
 0x29e   :  { %v463_v60 = vadd.f32 %v2250_v56, %v462_v59  ;;  %v2568_v61 = vpop.f32.mrb[2].mxu1  ;;  %v2982_v59 = vld [vmem:[#allocation10 + $0x8] sm:$0xff]  }
 0x29f   :  { %v474_v62 = vadd.f32 %v2568_v61, %v2250_v56  ;;  %v465_v63 = vpop.f32.mrb[3].mxu1  ;;  %v527_v1 = vmax.f32 %v471_v58, 0.0  ;;  %v2981_v58 = vld [vmem:[#allocation10] sm:$0xff]   ;;  %v2984_v61 = vld [vmem:[#allocation10 + $0x18] sm:$0xff]  }
 0x2a0   :  { %v466_v0 = vadd.f32 %v2250_v56, %v465_v63  ;;  %v525_v3 = vmax.f32 %v463_v60, 0.0  ;;  %2645 = vmatprep.subr.bf16.mxu0 %v2981_v58  ;;  %v2983_v60 = vld [vmem:[#allocation10 + $0x10] sm:$0xff]  }
 0x2a1   :  { %v528_v2 = vmax.f32 %v474_v62, 0.0  ;;  %v2986_v62 = vld [vmem:[#allocation10 + $0x28] sm:$0xff]  }
 0x2a2   :  { %v526_v4 = vmax.f32 %v466_v0, 0.0 }
 0x2a3   :  { %v542_v5 = vpack.c.bf16 %v528_v2, %v527_v1 }
 0x2a4   :  { %v2571_v6 = vpop.f32.mrb[4].mxu1  ;;  %v541_v7 = vpack.c.bf16 %v526_v4, %v525_v3 }
 0x2a5   :  { %v487_v8 = vadd.f32 %v2571_v6, %v2250_v56  ;;  %v478_v9 = vpop.f32.mrb[5].mxu1 }
 0x2a6   :  { %v479_v10 = vadd.f32 %v2250_v56, %v478_v9  ;;  %v2572_v11 = vpop.f32.mrb[6].mxu1  ;;  %2597 = vmatprep.mubr.bf16.mxu0 %v541_v7 }
 0x2a7   :  { %v490_v12 = vadd.f32 %v2572_v11, %v2250_v56  ;;  %v481_v13 = vpop.f32.mrb[7].mxu1  ;;  %2598 = vmatmul.mubr.bf16.vlgmr.msra.gmra.mrb[16].mxu0 %v542_v5  ;;  %v531_v15 = vmax.f32 %v487_v8, 0.0 }
 0x2a8   :  { %v482_v14 = vadd.f32 %v2250_v56, %v481_v13  ;;  %v529_v17 = vmax.f32 %v479_v10, 0.0  ;;  %2646 = vmatpush3.bf16.msra.mxu0 %v2981_v58 }
 0x2a9   :  { %v532_v16 = vmax.f32 %v490_v12, 0.0  ;;  %2647 = vmatprep.subr.bf16.mxu0 %v2982_v59 }
 0x2aa   :  { %v530_v18 = vmax.f32 %v482_v14, 0.0 }
 0x2ab   :  { %v544_v19 = vpack.c.bf16 %v532_v16, %v531_v15 }
 0x2ac   :  { %v543_v20 = vpack.c.bf16 %v530_v18, %v529_v17  ;;  %v2575_v21 = vpop.f32.mrb[8].mxu1  ;;  %2648 = vmatpush3.bf16.msra.mxu0 %v2982_v59 }
 0x2ad   :  { %v503_v22 = vadd.f32 %v2575_v21, %v2250_v56  ;;  %v494_v23 = vpop.f32.mrb[9].mxu1  ;;  %2649 = vmatprep.subr.bf16.mxu0 %v2983_v60 }
 0x2ae   :  { %v495_v24 = vadd.f32 %v2250_v56, %v494_v23  ;;  %v2576_v25 = vpop.f32.mrb[10].mxu1  ;;  %2601 = vmatprep.mubr.bf16.mxu0 %v543_v20  ;;  %v2987_v23 = vld [vmem:[#allocation10 + $0x30] sm:$0xff]  }
 0x2af   :  { %v506_v26 = vadd.f32 %v2576_v25, %v2250_v56  ;;  %v497_v27 = vpop.f32.mrb[11].mxu1  ;;  %2602 = vmatmul.mubr.bf16.gmra.mrb[20].mxu0 %v544_v19  ;;  %v535_v29 = vmax.f32 %v503_v22, 0.0  ;;  %v2259_v25 = vld [vmem:[%s3681_s9] ss:$0 sm:$0xff] }
 0x2b0   :  { %v498_v28 = vadd.f32 %v2250_v56, %v497_v27  ;;  %v533_v31 = vmax.f32 %v495_v24, 0.0  ;;  %2650 = vmatpush3.bf16.msra.mxu0 %v2983_v60  ;;  %v2988_v24 = vld [vmem:[#allocation10 + $0x38] sm:$0xff]  }
 0x2b1   :  { %v536_v30 = vmax.f32 %v506_v26, 0.0  ;;  %2651 = vmatprep.subr.bf16.mxu0 %v2984_v61 }
 0x2b2   :  { %v534_v32 = vmax.f32 %v498_v28, 0.0 }
 0x2b3   :  { %v546_v33 = vpack.c.bf16 %v536_v30, %v535_v29 }
 0x2b4   :  { %v545_v34 = vpack.c.bf16 %v534_v32, %v533_v31  ;;  %v2579_v36 = vpop.f32.mrb[12].mxu1  ;;  %2652 = vmatpush3.bf16.msra.mxu0 %v2984_v61 }
 0x2b5   :  { %v519_v37 = vadd.f32 %v2579_v36, %v2250_v56  ;;  %v510_v38 = vpop.f32.mrb[13].mxu1 }
 0x2b6   :  { %v511_v39 = vadd.f32 %v2250_v56, %v510_v38  ;;  %v2580_v40 = vpop.f32.mrb[14].mxu1  ;;  %2605 = vmatprep.mubr.bf16.mxu0 %v545_v34 }
 0x2b7   :  { %v522_v41 = vadd.f32 %v2580_v40, %v2250_v56  ;;  %v513_v42 = vpop.f32.mrb[15].mxu1  ;;  %2606 = vmatmul.mubr.bf16.gmra.mrb[24].mxu0 %v546_v33  ;;  %v539_v44 = vmax.f32 %v519_v37, 0.0 }
 0x2b8   :  { %v514_v43 = vadd.f32 %v2250_v56, %v513_v42  ;;  %v537_v46 = vmax.f32 %v511_v39, 0.0  ;;  %v2985_v56 = vld [vmem:[#allocation10 + $0x20] sm:$0xff]  }
 0x2b9   :  { %v540_v45 = vmax.f32 %v522_v41, 0.0  ;;  %2653 = vmatprep.subr.bf16.mxu0 %v2985_v56 }
 0x2ba   :  { %v538_v54 = vmax.f32 %v514_v43, 0.0  ;;  %2654 = vmatpush3.bf16.msra.mxu0 %v2985_v56 }
 0x2bb   :  { %v548_v55 = vpack.c.bf16 %v540_v45, %v539_v44  ;;  %2655 = vmatprep.subr.bf16.mxu0 %v2986_v62 }
 0x2bc   :  { %v547_v57 = vpack.c.bf16 %v538_v54, %v537_v46 }
 0x2be   :  { %2609 = vmatprep.mubr.bf16.mxu0 %v547_v57  ;;  %2656 = vmatpush3.bf16.msra.mxu0 %v2986_v62 }
 0x2bf   :  { %2610 = vmatmul.mubr.bf16.gmra.mrb[28].mxu0 %v548_v55  ;;  %2657 = vmatprep.subr.bf16.mxu0 %v2987_v23 }
 0x2c2   :  { %2658 = vmatpush3.bf16.msra.mxu0 %v2987_v23 }
 0x2c3   :  { %2659 = vmatprep.subr.bf16.mxu0 %v2988_v24 }
 0x2c6   :  { %2660 = vmatpush3.bf16.msra.mxu0 %v2988_v24 }
 0x37a   :  { %v2599_v63 = vpop.f32.mrb[16].mxu0 }
 0x37b   :  { %v647_v0 = vpop.f32.mrb[17].mxu0 }
 0x37c   :  { %v2600_v1 = vpop.f32.mrb[18].mxu0 }
 0x37d   :  { %v711_v2 = vpack.c.bf16 %v2600_v1, %v2599_v63  ;;  %v650_v3 = vpop.f32.mrb[19].mxu0 }
 0x37e   :  { %v710_v4 = vpack.c.bf16 %v650_v3, %v647_v0 }
 0x380   :  { %2613 = vmatprep.subr.bf16.mxu1 %v710_v4 }
 0x381   :  { %2614 = vmatpush3.bf16.msra.mxu1 %v710_v4 }
 0x382   :  { %v2603_v5 = vpop.f32.mrb[20].mxu0  ;;  %2615 = vmatprep.subr.bf16.mxu1 %v711_v2 }
 0x383   :  { %v663_v6 = vpop.f32.mrb[21].mxu0 }
 0x384   :  { %v2604_v7 = vpop.f32.mrb[22].mxu0 }
 0x385   :  { %v713_v8 = vpack.c.bf16 %v2604_v7, %v2603_v5  ;;  %v666_v9 = vpop.f32.mrb[23].mxu0  ;;  %2616 = vmatpush3.bf16.msra.mxu1 %v711_v2 }
 0x386   :  { %v712_v10 = vpack.c.bf16 %v666_v9, %v663_v6 }
 0x388   :  { %2617 = vmatprep.subr.bf16.mxu1 %v712_v10 }
 0x389   :  { %2618 = vmatpush3.bf16.msra.mxu1 %v712_v10 }
 0x38a   :  { %v2607_v11 = vpop.f32.mrb[24].mxu0  ;;  %2619 = vmatprep.subr.bf16.mxu1 %v713_v8 }
 0x38b   :  { %v679_v12 = vpop.f32.mrb[25].mxu0 }
 0x38c   :  { %v2608_v13 = vpop.f32.mrb[26].mxu0 }
 0x38d   :  { %v715_v14 = vpack.c.bf16 %v2608_v13, %v2607_v11  ;;  %v682_v15 = vpop.f32.mrb[27].mxu0  ;;  %2620 = vmatpush3.bf16.msra.mxu1 %v713_v8 }
 0x38e   :  { %v714_v16 = vpack.c.bf16 %v682_v15, %v679_v12 }
 0x390   :  { %2621 = vmatprep.subr.bf16.mxu1 %v714_v16 }
 0x391   :  { %2622 = vmatpush3.bf16.msra.mxu1 %v714_v16 }
 0x392   :  { %v2611_v17 = vpop.f32.mrb[28].mxu0  ;;  %2623 = vmatprep.subr.bf16.mxu1 %v715_v14 }
 0x393   :  { %v695_v18 = vpop.f32.mrb[29].mxu0 }
 0x394   :  { %v2612_v19 = vpop.f32.mrb[30].mxu0 }
 0x395   :  { %v717_v20 = vpack.c.bf16 %v2612_v19, %v2611_v17  ;;  %v698_v21 = vpop.f32.mrb[31].mxu0  ;;  %2624 = vmatpush3.bf16.msra.mxu1 %v715_v14 }
 0x396   :  { %v716_v22 = vpack.c.bf16 %v698_v21, %v695_v18 }
 0x398   :  { %2625 = vmatprep.subr.bf16.mxu1 %v716_v22 }
 0x399   :  { %2626 = vmatpush3.bf16.msra.mxu1 %v716_v22 }
 0x39a   :  { %2627 = vmatprep.subr.bf16.mxu1 %v717_v20 }
 0x39d   :  { %2628 = vmatpush3.bf16.msra.mxu1 %v717_v20 }
 0x3a0   :  { %2630 = vmatmul.mubr.bf16.vlgmr.msra.gmra.mrb[16].mxu1 %v3541_v47 }
 0x3a1   :  { %2633 = vmatprep.mubr.bf16.mxu1 %v3543_v48 }
 0x3a8   :  { %2634 = vmatmul.mubr.bf16.gmra.mrb[20].mxu1 %v3547_v49 }
 0x3a9   :  { %2637 = vmatprep.mubr.bf16.mxu1 %v3549_v50 }
 0x3b0   :  { %2638 = vmatmul.mubr.bf16.gmra.mrb[24].mxu1 %v3553_v51 }
 0x3b1   :  { %2641 = vmatprep.mubr.bf16.mxu1 %v3555_v52 }
 0x3b8   :  { %2642 = vmatmul.mubr.bf16.gmra.mrb[28].mxu1 %v3559_v53 }
 0x3b9   :  { %2693 = vmatprep.mubr.bf16.mxu1 %v3538_v35 }
 0x473   :  { %v2631_v26 = vpop.f32.mrb[16].mxu1 }
 0x474   :  { %v768_v27 = vadd.f32 %v2631_v26, %v2259_v25  ;;  %v759_v28 = vpop.f32.mrb[17].mxu1 }
 0x475   :  { %v760_v29 = vadd.f32 %v2259_v25, %v759_v28  ;;  %v2632_v30 = vpop.f32.mrb[18].mxu1  ;;  %v2990_v28 = vld [vmem:[#allocation12 + $0x8] sm:$0xff]  }
 0x476   :  { %v771_v31 = vadd.f32 %v2632_v30, %v2259_v25  ;;  %v762_v32 = vpop.f32.mrb[19].mxu1  ;;  %v824_v34 = vmax.f32 %v768_v27, 0.0  ;;  %v2989_v27 = vld [vmem:[#allocation12] sm:$0xff]   ;;  %v2992_v30 = vld [vmem:[#allocation12 + $0x18] sm:$0xff]  }
 0x477   :  { %v763_v33 = vadd.f32 %v2259_v25, %v762_v32  ;;  %v822_v37 = vmax.f32 %v760_v29, 0.0  ;;  %2709 = vmatprep.subr.bf16.mxu0 %v2989_v27  ;;  %v2991_v29 = vld [vmem:[#allocation12 + $0x10] sm:$0xff]  }
 0x478   :  { %v825_v36 = vmax.f32 %v771_v31, 0.0  ;;  %v2994_v31 = vld [vmem:[#allocation12 + $0x28] sm:$0xff]  }
 0x479   :  { %v823_v38 = vmax.f32 %v763_v33, 0.0 }
 0x47a   :  { %v839_v39 = vpack.c.bf16 %v825_v36, %v824_v34 }
 0x47b   :  { %v838_v40 = vpack.c.bf16 %v823_v38, %v822_v37  ;;  %v2635_v41 = vpop.f32.mrb[20].mxu1 }
 0x47c   :  { %v784_v42 = vadd.f32 %v2635_v41, %v2259_v25  ;;  %v775_v43 = vpop.f32.mrb[21].mxu1 }
 0x47d   :  { %v776_v44 = vadd.f32 %v2259_v25, %v775_v43  ;;  %v2636_v45 = vpop.f32.mrb[22].mxu1  ;;  %2661 = vmatprep.mubr.bf16.mxu0 %v838_v40 }
 0x47e   :  { %v787_v46 = vadd.f32 %v2636_v45, %v2259_v25  ;;  %v778_v54 = vpop.f32.mrb[23].mxu1  ;;  %2662 = vmatmul.mubr.bf16.vlgmr.msra.gmra.mrb[32].mxu0 %v839_v39  ;;  %v828_v57 = vmax.f32 %v784_v42, 0.0 }
 0x47f   :  { %v779_v55 = vadd.f32 %v2259_v25, %v778_v54  ;;  %v826_v59 = vmax.f32 %v776_v44, 0.0  ;;  %2710 = vmatpush3.bf16.msra.mxu0 %v2989_v27 }
 0x480   :  { %v829_v58 = vmax.f32 %v787_v46, 0.0  ;;  %2711 = vmatprep.subr.bf16.mxu0 %v2990_v28 }
 0x481   :  { %v827_v60 = vmax.f32 %v779_v55, 0.0 }
 0x482   :  { %v841_v61 = vpack.c.bf16 %v829_v58, %v828_v57 }
 0x483   :  { %v840_v56 = vpack.c.bf16 %v827_v60, %v826_v59  ;;  %v2639_v62 = vpop.f32.mrb[24].mxu1  ;;  %2712 = vmatpush3.bf16.msra.mxu0 %v2990_v28 }
 0x484   :  { %v800_v63 = vadd.f32 %v2639_v62, %v2259_v25  ;;  %v791_v0 = vpop.f32.mrb[25].mxu1  ;;  %2713 = vmatprep.subr.bf16.mxu0 %v2991_v29 }
 0x485   :  { %v792_v1 = vadd.f32 %v2259_v25, %v791_v0  ;;  %v2640_v2 = vpop.f32.mrb[26].mxu1  ;;  %2665 = vmatprep.mubr.bf16.mxu0 %v840_v56  ;;  %v2995_v0 = vld [vmem:[#allocation12 + $0x30] sm:$0xff]  }
 0x486   :  { %v803_v3 = vadd.f32 %v2640_v2, %v2259_v25  ;;  %v794_v4 = vpop.f32.mrb[27].mxu1  ;;  %2666 = vmatmul.mubr.bf16.gmra.mrb[36].mxu0 %v841_v61  ;;  %v832_v6 = vmax.f32 %v800_v63, 0.0  ;;  %v2268_v2 = vld [vmem:[%s3682_s10] ss:$0 sm:$0xff] }
 0x487   :  { %v795_v5 = vadd.f32 %v2259_v25, %v794_v4  ;;  %v830_v8 = vmax.f32 %v792_v1, 0.0  ;;  %2714 = vmatpush3.bf16.msra.mxu0 %v2991_v29  ;;  %v2996_v1 = vld [vmem:[#allocation12 + $0x38] sm:$0xff]  }
 0x488   :  { %v833_v7 = vmax.f32 %v803_v3, 0.0  ;;  %2715 = vmatprep.subr.bf16.mxu0 %v2992_v30 }
 0x489   :  { %v831_v9 = vmax.f32 %v795_v5, 0.0 }
 0x48a   :  { %v843_v10 = vpack.c.bf16 %v833_v7, %v832_v6 }
 0x48b   :  { %v842_v11 = vpack.c.bf16 %v831_v9, %v830_v8  ;;  %v2643_v12 = vpop.f32.mrb[28].mxu1  ;;  %2716 = vmatpush3.bf16.msra.mxu0 %v2992_v30 }
 0x48c   :  { %v816_v13 = vadd.f32 %v2643_v12, %v2259_v25  ;;  %v807_v14 = vpop.f32.mrb[29].mxu1 }
 0x48d   :  { %v808_v15 = vadd.f32 %v2259_v25, %v807_v14  ;;  %v2644_v16 = vpop.f32.mrb[30].mxu1  ;;  %2669 = vmatprep.mubr.bf16.mxu0 %v842_v11 }
 0x48e   :  { %v819_v17 = vadd.f32 %v2644_v16, %v2259_v25  ;;  %v810_v18 = vpop.f32.mrb[31].mxu1  ;;  %2670 = vmatmul.mubr.bf16.gmra.mrb[40].mxu0 %v843_v10  ;;  %v836_v20 = vmax.f32 %v816_v13, 0.0 }
 0x48f   :  { %v811_v19 = vadd.f32 %v2259_v25, %v810_v18  ;;  %v834_v22 = vmax.f32 %v808_v15, 0.0  ;;  %v2993_v25 = vld [vmem:[#allocation12 + $0x20] sm:$0xff]  }
 0x490   :  { %v837_v21 = vmax.f32 %v819_v17, 0.0  ;;  %2717 = vmatprep.subr.bf16.mxu0 %v2993_v25 }
 0x491   :  { %v835_v23 = vmax.f32 %v811_v19, 0.0  ;;  %2718 = vmatpush3.bf16.msra.mxu0 %v2993_v25 }
 0x492   :  { %v845_v24 = vpack.c.bf16 %v837_v21, %v836_v20  ;;  %2719 = vmatprep.subr.bf16.mxu0 %v2994_v31 }
 0x493   :  { %v844_v26 = vpack.c.bf16 %v835_v23, %v834_v22 }
 0x495   :  { %2673 = vmatprep.mubr.bf16.mxu0 %v844_v26  ;;  %2720 = vmatpush3.bf16.msra.mxu0 %v2994_v31 }
 0x496   :  { %2674 = vmatmul.mubr.bf16.gmra.mrb[44].mxu0 %v845_v24  ;;  %2721 = vmatprep.subr.bf16.mxu0 %v2995_v0 }
 0x499   :  { %2722 = vmatpush3.bf16.msra.mxu0 %v2995_v0 }
 0x49a   :  { %2723 = vmatprep.subr.bf16.mxu0 %v2996_v1 }
 0x49d   :  { %2724 = vmatpush3.bf16.msra.mxu0 %v2996_v1 }
 0x551   :  { %v2663_v32 = vpop.f32.mrb[32].mxu0 }
 0x552   :  { %v944_v33 = vpop.f32.mrb[33].mxu0 }
 0x553   :  { %v2664_v34 = vpop.f32.mrb[34].mxu0 }
 0x554   :  { %v1008_v36 = vpack.c.bf16 %v2664_v34, %v2663_v32  ;;  %v947_v37 = vpop.f32.mrb[35].mxu0 }
 0x555   :  { %v1007_v38 = vpack.c.bf16 %v947_v37, %v944_v33 }
 0x557   :  { %2677 = vmatprep.subr.bf16.mxu1 %v1007_v38 }
 0x558   :  { %2678 = vmatpush3.bf16.msra.mxu1 %v1007_v38 }
 0x559   :  { %v2667_v39 = vpop.f32.mrb[36].mxu0  ;;  %2679 = vmatprep.subr.bf16.mxu1 %v1008_v36 }
 0x55a   :  { %v960_v40 = vpop.f32.mrb[37].mxu0 }
 0x55b   :  { %v2668_v41 = vpop.f32.mrb[38].mxu0 }
 0x55c   :  { %v1010_v42 = vpack.c.bf16 %v2668_v41, %v2667_v39  ;;  %v963_v43 = vpop.f32.mrb[39].mxu0  ;;  %2680 = vmatpush3.bf16.msra.mxu1 %v1008_v36 }
 0x55d   :  { %v1009_v44 = vpack.c.bf16 %v963_v43, %v960_v40 }
 0x55f   :  { %2681 = vmatprep.subr.bf16.mxu1 %v1009_v44 }
 0x560   :  { %2682 = vmatpush3.bf16.msra.mxu1 %v1009_v44 }
 0x561   :  { %v2671_v45 = vpop.f32.mrb[40].mxu0  ;;  %2683 = vmatprep.subr.bf16.mxu1 %v1010_v42 }
 0x562   :  { %v976_v46 = vpop.f32.mrb[41].mxu0 }
 0x563   :  { %v2672_v54 = vpop.f32.mrb[42].mxu0 }
 0x564   :  { %v1012_v55 = vpack.c.bf16 %v2672_v54, %v2671_v45  ;;  %v979_v57 = vpop.f32.mrb[43].mxu0  ;;  %2684 = vmatpush3.bf16.msra.mxu1 %v1010_v42 }
 0x565   :  { %v1011_v58 = vpack.c.bf16 %v979_v57, %v976_v46 }
 0x567   :  { %2685 = vmatprep.subr.bf16.mxu1 %v1011_v58 }
 0x568   :  { %2686 = vmatpush3.bf16.msra.mxu1 %v1011_v58 }
 0x569   :  { %v2675_v59 = vpop.f32.mrb[44].mxu0  ;;  %2687 = vmatprep.subr.bf16.mxu1 %v1012_v55 }
 0x56a   :  { %v992_v60 = vpop.f32.mrb[45].mxu0 }
 0x56b   :  { %v2676_v61 = vpop.f32.mrb[46].mxu0 }
 0x56c   :  { %v1014_v56 = vpack.c.bf16 %v2676_v61, %v2675_v59  ;;  %v995_v62 = vpop.f32.mrb[47].mxu0  ;;  %2688 = vmatpush3.bf16.msra.mxu1 %v1012_v55 }
 0x56d   :  { %v1013_v63 = vpack.c.bf16 %v995_v62, %v992_v60 }
 0x56f   :  { %2689 = vmatprep.subr.bf16.mxu1 %v1013_v63 }
 0x570   :  { %2690 = vmatpush3.bf16.msra.mxu1 %v1013_v63 }
 0x571   :  { %2691 = vmatprep.subr.bf16.mxu1 %v1014_v56 }
 0x574   :  { %2692 = vmatpush3.bf16.msra.mxu1 %v1014_v56 }
 0x577   :  { %2694 = vmatmul.mubr.bf16.vlgmr.msra.gmra.mrb[32].mxu1 %v3541_v47 }
 0x578   :  { %2697 = vmatprep.mubr.bf16.mxu1 %v3543_v48 }
 0x57f   :  { %2698 = vmatmul.mubr.bf16.gmra.mrb[36].mxu1 %v3547_v49 }
 0x580   :  { %2701 = vmatprep.mubr.bf16.mxu1 %v3549_v50 }
 0x587   :  { %2702 = vmatmul.mubr.bf16.gmra.mrb[40].mxu1 %v3553_v51 }
 0x588   :  { %2705 = vmatprep.mubr.bf16.mxu1 %v3555_v52 }
 0x58f   :  { %2706 = vmatmul.mubr.bf16.gmra.mrb[44].mxu1 %v3559_v53 }
 0x590   :  { %2757 = vmatprep.mubr.bf16.mxu1 %v3538_v35 }
 0x64a   :  { %v2695_v3 = vpop.f32.mrb[32].mxu1 }
 0x64b   :  { %v1065_v4 = vadd.f32 %v2695_v3, %v2268_v2  ;;  %v1056_v5 = vpop.f32.mrb[33].mxu1  ;;  %v2997_v3 = vld [vmem:[#allocation13] sm:$0xff]  }
 0x64c   :  { %v1057_v6 = vadd.f32 %v2268_v2, %v1056_v5  ;;  %v2696_v7 = vpop.f32.mrb[34].mxu1  ;;  %2773 = vmatprep.subr.bf16.mxu0 %v2997_v3  ;;  %v2999_v5 = vld [vmem:[#allocation13 + $0x10] sm:$0xff]  }
 0x64d   :  { %v1068_v8 = vadd.f32 %v2696_v7, %v2268_v2  ;;  %v1059_v9 = vpop.f32.mrb[35].mxu1  ;;  %v1121_v11 = vmax.f32 %v1065_v4, 0.0  ;;  %v2998_v4 = vld [vmem:[#allocation13 + $0x8] sm:$0xff]  }
 0x64e   :  { %v1060_v10 = vadd.f32 %v2268_v2, %v1059_v9  ;;  %v1119_v12 = vmax.f32 %v1057_v6, 0.0  ;;  %v3000_v6 = vld [vmem:[#allocation13 + $0x18] sm:$0xff]   ;;  %v3002_v7 = vld [vmem:[#allocation13 + $0x28] sm:$0xff]  }
 0x64f   :  { %v1122_v35 = vmax.f32 %v1068_v8, 0.0 }
 0x650   :  { %v1120_v13 = vmax.f32 %v1060_v10, 0.0 }
 0x651   :  { %v1136_v14 = vpack.c.bf16 %v1122_v35, %v1121_v11 }
 0x652   :  { %v1135_v15 = vpack.c.bf16 %v1120_v13, %v1119_v12  ;;  %v2699_v16 = vpop.f32.mrb[36].mxu1 }
 0x653   :  { %v1081_v17 = vadd.f32 %v2699_v16, %v2268_v2  ;;  %v1072_v18 = vpop.f32.mrb[37].mxu1 }
 0x654   :  { %v1073_v19 = vadd.f32 %v2268_v2, %v1072_v18  ;;  %v2700_v20 = vpop.f32.mrb[38].mxu1  ;;  %2725 = vmatprep.mubr.bf16.mxu0 %v1135_v15 }
 0x655   :  { %v1084_v21 = vadd.f32 %v2700_v20, %v2268_v2  ;;  %v1075_v22 = vpop.f32.mrb[39].mxu1  ;;  %2726 = vmatmul.mubr.bf16.vlgmr.msra.gmra.mrb[48].mxu0 %v1136_v14  ;;  %v1125_v24 = vmax.f32 %v1081_v17, 0.0 }
 0x656   :  { %v1076_v23 = vadd.f32 %v2268_v2, %v1075_v22  ;;  %v1123_v27 = vmax.f32 %v1073_v19, 0.0  ;;  %2774 = vmatpush3.bf16.msra.mxu0 %v2997_v3 }
 0x657   :  { %v1126_v26 = vmax.f32 %v1084_v21, 0.0  ;;  %2775 = vmatprep.subr.bf16.mxu0 %v2998_v4 }
 0x658   :  { %v1124_v28 = vmax.f32 %v1076_v23, 0.0 }
 0x659   :  { %v1138_v29 = vpack.c.bf16 %v1126_v26, %v1125_v24 }
 0x65a   :  { %v1137_v30 = vpack.c.bf16 %v1124_v28, %v1123_v27  ;;  %v2703_v25 = vpop.f32.mrb[40].mxu1  ;;  %2776 = vmatpush3.bf16.msra.mxu0 %v2998_v4 }
 0x65b   :  { %v1097_v31 = vadd.f32 %v2703_v25, %v2268_v2  ;;  %v1088_v32 = vpop.f32.mrb[41].mxu1  ;;  %2777 = vmatprep.subr.bf16.mxu0 %v2999_v5 }
 0x65c   :  { %v1089_v33 = vadd.f32 %v2268_v2, %v1088_v32  ;;  %v2704_v34 = vpop.f32.mrb[42].mxu1  ;;  %2729 = vmatprep.mubr.bf16.mxu0 %v1137_v30  ;;  %v3003_v32 = vld [vmem:[#allocation13 + $0x30] sm:$0xff]  }
 0x65d   :  { %v1100_v36 = vadd.f32 %v2704_v34, %v2268_v2  ;;  %v1091_v37 = vpop.f32.mrb[43].mxu1  ;;  %2730 = vmatmul.mubr.bf16.gmra.mrb[52].mxu0 %v1138_v29  ;;  %v1129_v39 = vmax.f32 %v1097_v31, 0.0  ;;  %v3595_v31 = vld [vmem:[#allocation2] sm:$0xff] }
 0x65e   :  { %v1092_v38 = vadd.f32 %v2268_v2, %v1091_v37  ;;  %v1127_v41 = vmax.f32 %v1089_v33, 0.0  ;;  %2778 = vmatpush3.bf16.msra.mxu0 %v2999_v5 }
 0x65f   :  { %v1130_v40 = vmax.f32 %v1100_v36, 0.0  ;;  %2779 = vmatprep.subr.bf16.mxu0 %v3000_v6 }
 0x660   :  { %v1128_v42 = vmax.f32 %v1092_v38, 0.0 }
 0x661   :  { %v1140_v43 = vpack.c.bf16 %v1130_v40, %v1129_v39 }
 0x662   :  { %v1139_v44 = vpack.c.bf16 %v1128_v42, %v1127_v41  ;;  %v2707_v45 = vpop.f32.mrb[44].mxu1  ;;  %2780 = vmatpush3.bf16.msra.mxu0 %v3000_v6 }
 0x663   :  { %v1113_v46 = vadd.f32 %v2707_v45, %v2268_v2  ;;  %v1104_v54 = vpop.f32.mrb[45].mxu1 }
 0x664   :  { %v1105_v55 = vadd.f32 %v2268_v2, %v1104_v54  ;;  %v2708_v57 = vpop.f32.mrb[46].mxu1  ;;  %2733 = vmatprep.mubr.bf16.mxu0 %v1139_v44 }
 0x665   :  { %v1116_v58 = vadd.f32 %v2708_v57, %v2268_v2  ;;  %v1107_v59 = vpop.f32.mrb[47].mxu1  ;;  %2734 = vmatmul.mubr.bf16.gmra.mrb[56].mxu0 %v1140_v43  ;;  %v1133_v61 = vmax.f32 %v1113_v46, 0.0 }
 0x666   :  { %v1108_v60 = vadd.f32 %v2268_v2, %v1107_v59  ;;  %v1131_v62 = vmax.f32 %v1105_v55, 0.0  ;;  %v3001_v2 = vld [vmem:[#allocation13 + $0x20] sm:$0xff]  }
 0x667   :  { %v1134_v56 = vmax.f32 %v1116_v58, 0.0  ;;  %2781 = vmatprep.subr.bf16.mxu0 %v3001_v2 }
 0x668   :  { %v1132_v63 = vmax.f32 %v1108_v60, 0.0  ;;  %2782 = vmatpush3.bf16.msra.mxu0 %v3001_v2 }
 0x669   :  { %v1142_v0 = vpack.c.bf16 %v1134_v56, %v1133_v61  ;;  %2783 = vmatprep.subr.bf16.mxu0 %v3002_v7 }
 0x66a   :  { %v1141_v1 = vpack.c.bf16 %v1132_v63, %v1131_v62 }
 0x66c   :  { %2737 = vmatprep.mubr.bf16.mxu0 %v1141_v1  ;;  %2784 = vmatpush3.bf16.msra.mxu0 %v3002_v7 }
 0x66d   :  { %2738 = vmatmul.mubr.bf16.gmra.mrb[60].mxu0 %v1142_v0  ;;  %2785 = vmatprep.subr.bf16.mxu0 %v3003_v32 }
 0x670   :  { %2786 = vmatpush3.bf16.msra.mxu0 %v3003_v32  ;;  %v3009_v32 = vld [vmem:[#allocation15 + $0x20] sm:$0xff]  }
 0x728   :  { %v2727_v8 = vpop.f32.mrb[48].mxu0 }
 0x729   :  { %v1241_v9 = vpop.f32.mrb[49].mxu0 }
 0x72a   :  { %v2728_v10 = vpop.f32.mrb[50].mxu0 }
 0x72b   :  { %v1305_v11 = vpack.c.bf16 %v2728_v10, %v2727_v8  ;;  %v1244_v35 = vpop.f32.mrb[51].mxu0 }
 0x72c   :  { %v1304_v12 = vpack.c.bf16 %v1244_v35, %v1241_v9 }
 0x72e   :  { %2741 = vmatprep.subr.bf16.mxu1 %v1304_v12 }
 0x72f   :  { %2742 = vmatpush3.bf16.msra.mxu1 %v1304_v12 }
 0x730   :  { %v2731_v13 = vpop.f32.mrb[52].mxu0  ;;  %2743 = vmatprep.subr.bf16.mxu1 %v1305_v11 }
 0x731   :  { %v1257_v14 = vpop.f32.mrb[53].mxu0 }
 0x732   :  { %v2732_v15 = vpop.f32.mrb[54].mxu0 }
 0x733   :  { %v1307_v16 = vpack.c.bf16 %v2732_v15, %v2731_v13  ;;  %v1260_v17 = vpop.f32.mrb[55].mxu0  ;;  %2744 = vmatpush3.bf16.msra.mxu1 %v1305_v11 }
 0x734   :  { %v1306_v18 = vpack.c.bf16 %v1260_v17, %v1257_v14 }
 0x736   :  { %2745 = vmatprep.subr.bf16.mxu1 %v1306_v18 }
 0x737   :  { %2746 = vmatpush3.bf16.msra.mxu1 %v1306_v18 }
 0x738   :  { %v2735_v19 = vpop.f32.mrb[56].mxu0  ;;  %2747 = vmatprep.subr.bf16.mxu1 %v1307_v16 }
 0x739   :  { %v1273_v20 = vpop.f32.mrb[57].mxu0 }
 0x73a   :  { %v2736_v21 = vpop.f32.mrb[58].mxu0 }
 0x73b   :  { %v1309_v22 = vpack.c.bf16 %v2736_v21, %v2735_v19  ;;  %v1276_v23 = vpop.f32.mrb[59].mxu0  ;;  %2748 = vmatpush3.bf16.msra.mxu1 %v1307_v16 }
 0x73c   :  { %v1308_v24 = vpack.c.bf16 %v1276_v23, %v1273_v20 }
 0x73e   :  { %2749 = vmatprep.subr.bf16.mxu1 %v1308_v24 }
 0x73f   :  { %2750 = vmatpush3.bf16.msra.mxu1 %v1308_v24 }
 0x740   :  { %v2739_v26 = vpop.f32.mrb[60].mxu0  ;;  %2751 = vmatprep.subr.bf16.mxu1 %v1309_v22 }
 0x741   :  { %v1289_v27 = vpop.f32.mrb[61].mxu0 }
 0x742   :  { %v2740_v28 = vpop.f32.mrb[62].mxu0 }
 0x743   :  { %v1311_v29 = vpack.c.bf16 %v2740_v28, %v2739_v26  ;;  %v1292_v30 = vpop.f32.mrb[63].mxu0  ;;  %2752 = vmatpush3.bf16.msra.mxu1 %v1309_v22  ;;  %v3005_v28 = vld [vmem:[#allocation15] sm:$0xff]  }
 0x744   :  { %v1310_v25 = vpack.c.bf16 %v1292_v30, %v1289_v27  ;;  %v3007_v30 = vld [vmem:[#allocation15 + $0x10] sm:$0xff]  }
 0x746   :  { %2753 = vmatprep.subr.bf16.mxu1 %v1310_v25 }
 0x747   :  { %2754 = vmatpush3.bf16.msra.mxu1 %v1310_v25  ;;  %v3008_v25 = vld [vmem:[#allocation15 + $0x18] sm:$0xff]  }
 0x748   :  { %2755 = vmatprep.subr.bf16.mxu1 %v1311_v29 }
 0x74b   :  { %2756 = vmatpush3.bf16.msra.mxu1 %v1311_v29  ;;  %v3006_v29 = vld [vmem:[#allocation15 + $0x8] sm:$0xff]  }
 0x74e   :  { %2758 = vmatmul.mubr.bf16.vlgmr.msra.gmra.mrb[48].mxu1 %v3541_v47  ;;  %v3004_v47 = vld [vmem:[#allocation13 + $0x38] sm:$0xff]  }
 0x74f   :  { %2761 = vmatprep.mubr.bf16.mxu1 %v3543_v48  ;;  %2787 = vmatprep.subr.bf16.mxu0 %v3004_v47  ;;  %v2277_v48 = vld [vmem:[%s3683_s11] ss:$0 sm:$0xff] }
 0x750   :  { %2788 = vmatpush3.bf16.msra.mxu0 %v3004_v47  ;;  %v3010_v47 = vld [vmem:[#allocation15 + $0x28] sm:$0xff]  }
 0x751   :  { %2837 = vmatprep.subr.bf16.mxu0 %v3005_v28 }
 0x756   :  { %2762 = vmatmul.mubr.bf16.gmra.mrb[52].mxu1 %v3547_v49 }
 0x757   :  { %2765 = vmatprep.mubr.bf16.mxu1 %v3549_v50 }
 0x75e   :  { %2766 = vmatmul.mubr.bf16.gmra.mrb[56].mxu1 %v3553_v51 }
 0x75f   :  { %2769 = vmatprep.mubr.bf16.mxu1 %v3555_v52 }
 0x766   :  { %2770 = vmatmul.mubr.bf16.gmra.mrb[60].mxu1 %v3559_v53 }
 0x767   :  { %2821 = vmatprep.mubr.bf16.mxu1 %v3595_v31 }
 0x821   :  { %v2759_v49 = vpop.f32.mrb[48].mxu1 }
 0x822   :  { %v1362_v50 = vadd.f32 %v2759_v49, %v2277_v48  ;;  %v1353_v51 = vpop.f32.mrb[49].mxu1 }
 0x823   :  { %v1354_v52 = vadd.f32 %v2277_v48, %v1353_v51  ;;  %v2760_v33 = vpop.f32.mrb[50].mxu1 }
 0x824   :  { %v1365_v53 = vadd.f32 %v2760_v33, %v2277_v48  ;;  %v1356_v34 = vpop.f32.mrb[51].mxu1  ;;  %v1418_v37 = vmax.f32 %v1362_v50, 0.0 }
 0x825   :  { %v1357_v36 = vadd.f32 %v2277_v48, %v1356_v34  ;;  %v1416_v39 = vmax.f32 %v1354_v52, 0.0 }
 0x826   :  { %v1419_v38 = vmax.f32 %v1365_v53, 0.0 }
 0x827   :  { %v1417_v40 = vmax.f32 %v1357_v36, 0.0 }
 0x828   :  { %v1433_v41 = vpack.c.bf16 %v1419_v38, %v1418_v37 }
 0x829   :  { %v1432_v42 = vpack.c.bf16 %v1417_v40, %v1416_v39  ;;  %v2763_v43 = vpop.f32.mrb[52].mxu1 }
 0x82a   :  { %v1378_v44 = vadd.f32 %v2763_v43, %v2277_v48  ;;  %v1369_v45 = vpop.f32.mrb[53].mxu1 }
 0x82b   :  { %v1370_v46 = vadd.f32 %v2277_v48, %v1369_v45  ;;  %v2764_v54 = vpop.f32.mrb[54].mxu1  ;;  %2789 = vmatprep.mubr.bf16.mxu0 %v1432_v42 }
 0x82c   :  { %v1381_v55 = vadd.f32 %v2764_v54, %v2277_v48  ;;  %v1372_v57 = vpop.f32.mrb[55].mxu1  ;;  %2790 = vmatmul.mubr.bf16.vlgmr.msra.gmra.mrb[64].mxu0 %v1433_v41  ;;  %v1422_v59 = vmax.f32 %v1378_v44, 0.0 }
 0x82d   :  { %v1373_v58 = vadd.f32 %v2277_v48, %v1372_v57  ;;  %v1420_v61 = vmax.f32 %v1370_v46, 0.0  ;;  %2838 = vmatpush3.bf16.msra.mxu0 %v3005_v28 }
 0x82e   :  { %v1423_v60 = vmax.f32 %v1381_v55, 0.0  ;;  %2839 = vmatprep.subr.bf16.mxu0 %v3006_v29 }
 0x82f   :  { %v1421_v56 = vmax.f32 %v1373_v58, 0.0 }
 0x830   :  { %v1435_v62 = vpack.c.bf16 %v1423_v60, %v1422_v59  ;;  %v3601_v60 = vld [vmem:[#allocation2 + $0x8] sm:$0xff] }
 0x831   :  { %v1434_v63 = vpack.c.bf16 %v1421_v56, %v1420_v61  ;;  %v2767_v0 = vpop.f32.mrb[56].mxu1  ;;  %2840 = vmatpush3.bf16.msra.mxu0 %v3006_v29  ;;  %v3604_v61 = vld [vmem:[#allocation2 + $0x10] sm:$0xff]  ;;  %v3607_v56 = vld [vmem:[#allocation2 + $0x18] sm:$0xff] }
 0x832   :  { %v1394_v1 = vadd.f32 %v2767_v0, %v2277_v48  ;;  %v1385_v3 = vpop.f32.mrb[57].mxu1  ;;  %2841 = vmatprep.subr.bf16.mxu0 %v3007_v30  ;;  %v3616_v0 = vld [vmem:[#allocation2 + $0x30] sm:$0xff] }
 0x833   :  { %v1386_v4 = vadd.f32 %v2277_v48, %v1385_v3  ;;  %v2768_v5 = vpop.f32.mrb[58].mxu1  ;;  %2793 = vmatprep.mubr.bf16.mxu0 %v1434_v63  ;;  %v3613_v63 = vld [vmem:[#allocation2 + $0x28] sm:$0xff]  ;;  %v3011_v3 = vld [vmem:[#allocation15 + $0x30] sm:$0xff]  }
 0x834   :  { %v1397_v6 = vadd.f32 %v2768_v5, %v2277_v48  ;;  %v1388_v2 = vpop.f32.mrb[59].mxu1  ;;  %2794 = vmatmul.mubr.bf16.gmra.mrb[68].mxu0 %v1435_v62  ;;  %v1426_v8 = vmax.f32 %v1394_v1, 0.0  ;;  %v3610_v62 = vld [vmem:[#allocation2 + $0x20] sm:$0xff]  ;;  %v3619_v1 = vld [vmem:[#allocation2 + $0x38] sm:$0xff] }
 0x835   :  { %v1389_v7 = vadd.f32 %v2277_v48, %v1388_v2  ;;  %v1424_v10 = vmax.f32 %v1386_v4, 0.0  ;;  %2842 = vmatpush3.bf16.msra.mxu0 %v3007_v30  ;;  %v3012_v4 = vld [vmem:[#allocation15 + $0x38] sm:$0xff]   ;;  %v2286_v5 = vld [vmem:[%s3684_s12] ss:$0 sm:$0xff] }
 0x836   :  { %v1427_v9 = vmax.f32 %v1397_v6, 0.0  ;;  %2843 = vmatprep.subr.bf16.mxu0 %v3008_v25 }
 0x837   :  { %v1425_v11 = vmax.f32 %v1389_v7, 0.0 }
 0x838   :  { %v1437_v35 = vpack.c.bf16 %v1427_v9, %v1426_v8 }
 0x839   :  { %v1436_v12 = vpack.c.bf16 %v1425_v11, %v1424_v10  ;;  %v2771_v13 = vpop.f32.mrb[60].mxu1  ;;  %2844 = vmatpush3.bf16.msra.mxu0 %v3008_v25 }
 0x83a   :  { %v1410_v14 = vadd.f32 %v2771_v13, %v2277_v48  ;;  %v1401_v15 = vpop.f32.mrb[61].mxu1  ;;  %2845 = vmatprep.subr.bf16.mxu0 %v3009_v32 }
 0x83b   :  { %v1402_v16 = vadd.f32 %v2277_v48, %v1401_v15  ;;  %v2772_v17 = vpop.f32.mrb[62].mxu1  ;;  %2797 = vmatprep.mubr.bf16.mxu0 %v1436_v12 }
 0x83c   :  { %v1413_v18 = vadd.f32 %v2772_v17, %v2277_v48  ;;  %v1404_v19 = vpop.f32.mrb[63].mxu1  ;;  %2798 = vmatmul.mubr.bf16.gmra.mrb[72].mxu0 %v1437_v35  ;;  %v1430_v21 = vmax.f32 %v1410_v14, 0.0 }
 0x83d   :  { %v1405_v20 = vadd.f32 %v2277_v48, %v1404_v19  ;;  %v1428_v23 = vmax.f32 %v1402_v16, 0.0  ;;  %2846 = vmatpush3.bf16.msra.mxu0 %v3009_v32 }
 0x83e   :  { %v1431_v22 = vmax.f32 %v1413_v18, 0.0  ;;  %2847 = vmatprep.subr.bf16.mxu0 %v3010_v47 }
 0x83f   :  { %v1429_v24 = vmax.f32 %v1405_v20, 0.0 }
 0x840   :  { %v1439_v26 = vpack.c.bf16 %v1431_v22, %v1430_v21 }
 0x841   :  { %v1438_v27 = vpack.c.bf16 %v1429_v24, %v1428_v23  ;;  %2848 = vmatpush3.bf16.msra.mxu0 %v3010_v47 }
 0x842   :  { %2849 = vmatprep.subr.bf16.mxu0 %v3011_v3 }
 0x843   :  { %2801 = vmatprep.mubr.bf16.mxu0 %v1438_v27 }
 0x844   :  { %2802 = vmatmul.mubr.bf16.gmra.mrb[76].mxu0 %v1439_v26 }
 0x845   :  { %2850 = vmatpush3.bf16.msra.mxu0 %v3011_v3 }
 0x846   :  { %2851 = vmatprep.subr.bf16.mxu0 %v3012_v4 }
 0x849   :  { %2852 = vmatpush3.bf16.msra.mxu0 %v3012_v4 }
 0x8ff   :  { %v2791_v48 = vpop.f32.mrb[64].mxu0 }
 0x900   :  { %v1538_v49 = vpop.f32.mrb[65].mxu0 }
 0x901   :  { %v2792_v50 = vpop.f32.mrb[66].mxu0 }
 0x902   :  { %v1602_v51 = vpack.c.bf16 %v2792_v50, %v2791_v48  ;;  %v1541_v52 = vpop.f32.mrb[67].mxu0 }
 0x903   :  { %v1601_v33 = vpack.c.bf16 %v1541_v52, %v1538_v49 }
 0x905   :  { %2805 = vmatprep.subr.bf16.mxu1 %v1601_v33 }
 0x906   :  { %2806 = vmatpush3.bf16.msra.mxu1 %v1601_v33 }
 0x907   :  { %v2795_v53 = vpop.f32.mrb[68].mxu0  ;;  %2807 = vmatprep.subr.bf16.mxu1 %v1602_v51 }
 0x908   :  { %v1554_v34 = vpop.f32.mrb[69].mxu0 }
 0x909   :  { %v2796_v36 = vpop.f32.mrb[70].mxu0 }
 0x90a   :  { %v1604_v37 = vpack.c.bf16 %v2796_v36, %v2795_v53  ;;  %v1557_v38 = vpop.f32.mrb[71].mxu0  ;;  %2808 = vmatpush3.bf16.msra.mxu1 %v1602_v51 }
 0x90b   :  { %v1603_v39 = vpack.c.bf16 %v1557_v38, %v1554_v34 }
 0x90d   :  { %2809 = vmatprep.subr.bf16.mxu1 %v1603_v39 }
 0x90e   :  { %2810 = vmatpush3.bf16.msra.mxu1 %v1603_v39 }
 0x90f   :  { %v2799_v40 = vpop.f32.mrb[72].mxu0  ;;  %2811 = vmatprep.subr.bf16.mxu1 %v1604_v37 }
 0x910   :  { %v1570_v41 = vpop.f32.mrb[73].mxu0 }
 0x911   :  { %v2800_v42 = vpop.f32.mrb[74].mxu0 }
 0x912   :  { %v1606_v43 = vpack.c.bf16 %v2800_v42, %v2799_v40  ;;  %v1573_v44 = vpop.f32.mrb[75].mxu0  ;;  %2812 = vmatpush3.bf16.msra.mxu1 %v1604_v37 }
 0x913   :  { %v1605_v45 = vpack.c.bf16 %v1573_v44, %v1570_v41 }
 0x915   :  { %2813 = vmatprep.subr.bf16.mxu1 %v1605_v45 }
 0x916   :  { %2814 = vmatpush3.bf16.msra.mxu1 %v1605_v45 }
 0x917   :  { %v2803_v46 = vpop.f32.mrb[76].mxu0  ;;  %2815 = vmatprep.subr.bf16.mxu1 %v1606_v43 }
 0x918   :  { %v1586_v54 = vpop.f32.mrb[77].mxu0 }
 0x919   :  { %v2804_v55 = vpop.f32.mrb[78].mxu0 }
 0x91a   :  { %v1608_v57 = vpack.c.bf16 %v2804_v55, %v2803_v46  ;;  %v1589_v58 = vpop.f32.mrb[79].mxu0  ;;  %2816 = vmatpush3.bf16.msra.mxu1 %v1606_v43 }
 0x91b   :  { %v1607_v59 = vpack.c.bf16 %v1589_v58, %v1586_v54 }
 0x91d   :  { %2817 = vmatprep.subr.bf16.mxu1 %v1607_v59 }
 0x91e   :  { %2818 = vmatpush3.bf16.msra.mxu1 %v1607_v59 }
 0x91f   :  { %2819 = vmatprep.subr.bf16.mxu1 %v1608_v57 }
 0x922   :  { %2820 = vmatpush3.bf16.msra.mxu1 %v1608_v57 }
 0x925   :  { %2822 = vmatmul.mubr.bf16.vlgmr.msra.gmra.mrb[64].mxu1 %v3601_v60 }
 0x926   :  { %2825 = vmatprep.mubr.bf16.mxu1 %v3604_v61 }
 0x92d   :  { %2826 = vmatmul.mubr.bf16.gmra.mrb[68].mxu1 %v3607_v56 }
 0x92e   :  { %2829 = vmatprep.mubr.bf16.mxu1 %v3610_v62 }
 0x935   :  { %2830 = vmatmul.mubr.bf16.gmra.mrb[72].mxu1 %v3613_v63 }
 0x936   :  { %2833 = vmatprep.mubr.bf16.mxu1 %v3616_v0 }
 0x93d   :  { %2834 = vmatmul.mubr.bf16.gmra.mrb[76].mxu1 %v3619_v1 }
 0x93e   :  { %2885 = vmatprep.mubr.bf16.mxu1 %v3595_v31 }
 0x9f8   :  { %v2823_v6 = vpop.f32.mrb[64].mxu1 }
 0x9f9   :  { %v1659_v2 = vadd.f32 %v2823_v6, %v2286_v5  ;;  %v1650_v7 = vpop.f32.mrb[65].mxu1 }
 0x9fa   :  { %v1651_v8 = vadd.f32 %v2286_v5, %v1650_v7  ;;  %v2824_v9 = vpop.f32.mrb[66].mxu1 }
 0x9fb   :  { %v1662_v10 = vadd.f32 %v2824_v9, %v2286_v5  ;;  %v1653_v11 = vpop.f32.mrb[67].mxu1  ;;  %v1715_v12 = vmax.f32 %v1659_v2, 0.0 }
 0x9fc   :  { %v1654_v35 = vadd.f32 %v2286_v5, %v1653_v11  ;;  %v1713_v13 = vmax.f32 %v1651_v8, 0.0 }
 0x9fd   :  { %v1716_v31 = vmax.f32 %v1662_v10, 0.0 }
 0x9fe   :  { %v1714_v14 = vmax.f32 %v1654_v35, 0.0 }
 0x9ff   :  { %v1730_v15 = vpack.c.bf16 %v1716_v31, %v1715_v12 }
 0xa00   :  { %v1729_v16 = vpack.c.bf16 %v1714_v14, %v1713_v13  ;;  %v2827_v17 = vpop.f32.mrb[68].mxu1 }
 0xa01   :  { %v1675_v18 = vadd.f32 %v2827_v17, %v2286_v5  ;;  %v1666_v19 = vpop.f32.mrb[69].mxu1 }
 0xa02   :  { %v1667_v20 = vadd.f32 %v2286_v5, %v1666_v19  ;;  %v2828_v21 = vpop.f32.mrb[70].mxu1  ;;  %2853 = vmatprep.mubr.bf16.mxu0 %v1729_v16 }
 0xa03   :  { %v1678_v22 = vadd.f32 %v2828_v21, %v2286_v5  ;;  %v1669_v23 = vpop.f32.mrb[71].mxu1  ;;  %2854 = vmatmul.mubr.bf16.vlgmr.msra.gmra.mrb[80].mxu0 %v1730_v15  ;;  %v1719_v26 = vmax.f32 %v1675_v18, 0.0 }
 0xa04   :  { %v1670_v24 = vadd.f32 %v2286_v5, %v1669_v23  ;;  %v1717_v28 = vmax.f32 %v1667_v20, 0.0 }
 0xa05   :  { %v1720_v27 = vmax.f32 %v1678_v22, 0.0 }
 0xa06   :  { %v1718_v29 = vmax.f32 %v1670_v24, 0.0 }
 0xa07   :  { %v1732_v30 = vpack.c.bf16 %v1720_v27, %v1719_v26  ;;  %v3283_v27 = vmov 0.0  }
 0xa08   :  { %v1731_v25 = vpack.c.bf16 %v1718_v29, %v1717_v28  ;;  %v2831_v32 = vpop.f32.mrb[72].mxu1  ;;  %2901 = vmatprep.subr.bf16.mxu0 %v3283_v27  ;;  %v2295_v29 = vld [vmem:[%s3685_s13] ss:$0 sm:$0xff] }
 0xa09   :  { %v1691_v47 = vadd.f32 %v2831_v32, %v2286_v5  ;;  %v1682_v48 = vpop.f32.mrb[73].mxu1 }
 0xa0a   :  { %v1683_v49 = vadd.f32 %v2286_v5, %v1682_v48  ;;  %v2832_v50 = vpop.f32.mrb[74].mxu1  ;;  %2857 = vmatprep.mubr.bf16.mxu0 %v1731_v25 }
 0xa0b   :  { %v1694_v51 = vadd.f32 %v2832_v50, %v2286_v5  ;;  %v1685_v52 = vpop.f32.mrb[75].mxu1  ;;  %2858 = vmatmul.mubr.bf16.gmra.mrb[84].mxu0 %v1732_v30  ;;  %v1723_v53 = vmax.f32 %v1691_v47, 0.0 }
 0xa0c   :  { %v1686_v33 = vadd.f32 %v2286_v5, %v1685_v52  ;;  %v1721_v36 = vmax.f32 %v1683_v49, 0.0 }
 0xa0d   :  { %v1724_v34 = vmax.f32 %v1694_v51, 0.0 }
 0xa0e   :  { %v1722_v37 = vmax.f32 %v1686_v33, 0.0 }
 0xa0f   :  { %v1734_v38 = vpack.c.bf16 %v1724_v34, %v1723_v53 }
 0xa10   :  { %v1733_v39 = vpack.c.bf16 %v1722_v37, %v1721_v36  ;;  %v2835_v40 = vpop.f32.mrb[76].mxu1 }
 0xa11   :  { %v1707_v41 = vadd.f32 %v2835_v40, %v2286_v5  ;;  %v1698_v42 = vpop.f32.mrb[77].mxu1 }
 0xa12   :  { %v1699_v43 = vadd.f32 %v2286_v5, %v1698_v42  ;;  %v2836_v44 = vpop.f32.mrb[78].mxu1  ;;  %2861 = vmatprep.mubr.bf16.mxu0 %v1733_v39 }
 0xa13   :  { %v1710_v45 = vadd.f32 %v2836_v44, %v2286_v5  ;;  %v1701_v46 = vpop.f32.mrb[79].mxu1  ;;  %2862 = vmatmul.mubr.bf16.gmra.mrb[88].mxu0 %v1734_v38  ;;  %v1727_v55 = vmax.f32 %v1707_v41, 0.0 }
 0xa14   :  { %v1702_v54 = vadd.f32 %v2286_v5, %v1701_v46  ;;  %v1725_v58 = vmax.f32 %v1699_v43, 0.0 }
 0xa15   :  { %v1728_v57 = vmax.f32 %v1710_v45, 0.0 }
 0xa16   :  { %v1726_v59 = vmax.f32 %v1702_v54, 0.0 }
 0xa17   :  { %v1736_v3 = vpack.c.bf16 %v1728_v57, %v1727_v55 }
 0xa18   :  { %v1735_v4 = vpack.c.bf16 %v1726_v59, %v1725_v58 }
 0xa1a   :  { %2865 = vmatprep.mubr.bf16.mxu0 %v1735_v4 }
 0xa1b   :  { %2866 = vmatmul.mubr.bf16.gmra.mrb[92].mxu0 %v1736_v3 }
 0xa1c   :  { %2917 = vmatprep.mubr.msk.bf16.mxu0 %vm3284_vm0, %v3283_v27 }
 0xad6   :  { %v2855_v6 = vpop.f32.mrb[80].mxu0 }
 0xad7   :  { %v1835_v2 = vpop.f32.mrb[81].mxu0 }
 0xad8   :  { %v2856_v7 = vpop.f32.mrb[82].mxu0 }
 0xad9   :  { %v1899_v8 = vpack.c.bf16 %v2856_v7, %v2855_v6  ;;  %v1838_v9 = vpop.f32.mrb[83].mxu0 }
 0xada   :  { %v1898_v10 = vpack.c.bf16 %v1838_v9, %v1835_v2 }
 0xadc   :  { %2869 = vmatprep.subr.bf16.mxu1 %v1898_v10 }
 0xadd   :  { %2870 = vmatpush3.bf16.msra.mxu1 %v1898_v10 }
 0xade   :  { %v2859_v11 = vpop.f32.mrb[84].mxu0  ;;  %2871 = vmatprep.subr.bf16.mxu1 %v1899_v8 }
 0xadf   :  { %v1851_v35 = vpop.f32.mrb[85].mxu0 }
 0xae0   :  { %v2860_v5 = vpop.f32.mrb[86].mxu0 }
 0xae1   :  { %v1901_v12 = vpack.c.bf16 %v2860_v5, %v2859_v11  ;;  %v1854_v31 = vpop.f32.mrb[87].mxu0  ;;  %2872 = vmatpush3.bf16.msra.mxu1 %v1899_v8 }
 0xae2   :  { %v1900_v13 = vpack.c.bf16 %v1854_v31, %v1851_v35  ;;  %v3021_v31 = vld [vmem:[#allocation16 + $0x38] sm:$0xff]  }
 0xae4   :  { %2873 = vmatprep.subr.bf16.mxu1 %v1900_v13 }
 0xae5   :  { %2874 = vmatpush3.bf16.msra.mxu1 %v1900_v13 }
 0xae6   :  { %v2863_v14 = vpop.f32.mrb[88].mxu0  ;;  %2875 = vmatprep.subr.bf16.mxu1 %v1901_v12 }
 0xae7   :  { %v1867_v15 = vpop.f32.mrb[89].mxu0 }
 0xae8   :  { %v2864_v16 = vpop.f32.mrb[90].mxu0 }
 0xae9   :  { %v1903_v17 = vpack.c.bf16 %v2864_v16, %v2863_v14  ;;  %v1870_v18 = vpop.f32.mrb[91].mxu0  ;;  %2876 = vmatpush3.bf16.msra.mxu1 %v1901_v12  ;;  %v3013_v12 = vld [vmem:[%s3686_s14] sm:$0xff]   ;;  %s3285_s14 = smov [#allocation18]  }
 0xaea   :  { %v1902_v19 = vpack.c.bf16 %v1870_v18, %v1867_v15  ;;  %v2180_v18 = vlaneseq }
 0xaec   :  { %2877 = vmatprep.subr.bf16.mxu1 %v1902_v19 }
 0xaed   :  { %2878 = vmatpush3.bf16.msra.mxu1 %v1902_v19  ;;  %v2181_v19 = vand.u32 127, %v2180_v18 }
 0xaee   :  { %v2867_v20 = vpop.f32.mrb[92].mxu0  ;;  %2879 = vmatprep.subr.bf16.mxu1 %v1903_v17 }
 0xaef   :  { %v1883_v21 = vpop.f32.mrb[93].mxu0  ;;  %vm2182_vm1 = vcmp.lt.s32.totalorder %v2181_v19, 4 }
 0xaf0   :  { %v2868_v22 = vpop.f32.mrb[94].mxu0 }
 0xaf1   :  { %v1905_v23 = vpack.c.bf16 %v2868_v22, %v2867_v20  ;;  %v1886_v24 = vpop.f32.mrb[95].mxu0  ;;  %2880 = vmatpush3.bf16.msra.mxu1 %v1903_v17  ;;  %v2297_v20 = vld [vmem:[%s3688_s16] ss:$0 sm:$0xff]  ;;  %s2212_s16 = sshll.u32 %s3285_s14, 4  ;;  %s2213_s16 = int_to_ptr.vmem [resolvable:$true] %s2212_s16 }
 0xaf2   :  { %v1904_v26 = vpack.c.bf16 %v1886_v24, %v1883_v21  ;;  %s3236_s21 = scalar_lea.vmem %s2213_s16, 256  ;;  %p3241_p3 = scmp.lt.s32.totalorder %s2213_s16, %s2213_s16 }
 0xaf3   :  { %p3237_p2 = scmp.ne.s32.totalorder %s2213_s16, %s3236_s21  ;;  %p3242_p4 = scmp.lt.s32.totalorder %s3236_s21, %s3236_s21 }
 0xaf4   :  { %2881 = vmatprep.subr.bf16.mxu1 %v1904_v26 }
 0xaf5   :  { %2882 = vmatpush3.bf16.msra.mxu1 %v1904_v26  ;;  %p3243_p5 = por %p3242_p4, %p3241_p3 }
 0xaf6   :  { %2883 = vmatprep.subr.bf16.mxu1 %v1905_v23 }
 0xaf7   :  { %p3244_p6 = pnand %p3243_p5, %p3237_p2 }
 0xaf9   :  { %2884 = vmatpush3.bf16.msra.mxu1 %v1905_v23 }
 0xafa   :  { %2921 = vmatprep.subr.bf16.mxu1 %v3283_v27 }
 0xafc   :  { %2886 = vmatmul.mubr.bf16.vlgmr.msra.gmra.mrb[80].mxu1 %v3601_v60  ;;  %v3014_v60 = vld [vmem:[#allocation16] sm:$0xff]  }
 0xafd   :  { %2889 = vmatprep.mubr.bf16.mxu1 %v3604_v61  ;;  %2922 = vmatpush3.bf16.msra.mxu1 %v3014_v60  ;;  %v3015_v61 = vld [vmem:[#allocation16 + $0x8] sm:$0xff]  }
 0xafe   :  { %2923 = vmatprep.subr.bf16.mxu1 %v3283_v27 }
 0xb01   :  { %2924 = vmatpush3.bf16.msra.mxu1 %v3015_v61 }
 0xb02   :  { %2925 = vmatprep.subr.bf16.mxu1 %v3283_v27 }
 0xb04   :  { %2890 = vmatmul.mubr.bf16.gmra.mrb[84].mxu1 %v3607_v56  ;;  %v3016_v56 = vld [vmem:[#allocation16 + $0x10] sm:$0xff]  }
 0xb05   :  { %2893 = vmatprep.mubr.bf16.mxu1 %v3610_v62  ;;  %2926 = vmatpush3.bf16.msra.mxu1 %v3016_v56  ;;  %v3017_v62 = vld [vmem:[#allocation16 + $0x18] sm:$0xff]  }
 0xb06   :  { %2927 = vmatprep.subr.bf16.mxu1 %v3283_v27 }
 0xb09   :  { %2928 = vmatpush3.bf16.msra.mxu1 %v3017_v62 }
 0xb0a   :  { %2929 = vmatprep.subr.bf16.mxu1 %v3283_v27 }
 0xb0c   :  { %2894 = vmatmul.mubr.bf16.gmra.mrb[88].mxu1 %v3613_v63  ;;  %v3018_v63 = vld [vmem:[#allocation16 + $0x20] sm:$0xff]  }
 0xb0d   :  { %2897 = vmatprep.mubr.bf16.mxu1 %v3616_v0  ;;  %2930 = vmatpush3.bf16.msra.mxu1 %v3018_v63  ;;  %v3019_v0 = vld [vmem:[#allocation16 + $0x28] sm:$0xff]  }
 0xb0e   :  { %2931 = vmatprep.subr.bf16.mxu1 %v3283_v27 }
 0xb11   :  { %2932 = vmatpush3.bf16.msra.mxu1 %v3019_v0 }
 0xb12   :  { %2933 = vmatprep.subr.bf16.mxu1 %v3283_v27 }
 0xb14   :  { %2898 = vmatmul.mubr.bf16.gmra.mrb[92].mxu1 %v3619_v1  ;;  %v3020_v1 = vld [vmem:[#allocation16 + $0x30] sm:$0xff]  }
 0xb15   :  { %2937 = vmatprep.mubr.msk.bf16.mxu1 %vm3284_vm0, %v3283_v27  ;;  %2934 = vmatpush3.bf16.msra.mxu1 %v3020_v1 }
 0xb16   :  { %2935 = vmatprep.subr.bf16.mxu1 %v3283_v27 }
 0xb19   :  { %2936 = vmatpush3.bf16.msra.mxu1 %v3021_v31 }
 0xbcf   :  { %v2887_v28 = vpop.f32.mrb[80].mxu1 }
 0xbd0   :  { %v1947_v30 = vpop.f32.mrb[81].mxu1  ;;  %v1956_v32 = vadd.f32 %v2887_v28, %v2295_v29 }
 0xbd1   :  { %v2888_v25 = vpop.f32.mrb[82].mxu1  ;;  %v1948_v49 = vadd.f32 %v2295_v29, %v1947_v30 }
 0xbd2   :  { %v1959_v47 = vadd.f32 %v2888_v25, %v2295_v29  ;;  %v1950_v48 = vpop.f32.mrb[83].mxu1 }
 0xbd3   :  { %v1951_v50 = vadd.f32 %v2295_v29, %v1950_v48 }
 0xbd4   :  { %v2011_v51 = vpack.c.bf16 %v1959_v47, %v1956_v32 }
 0xbd5   :  { %v2010_v52 = vpack.c.bf16 %v1951_v50, %v1948_v49 }
 0xbd7   :  { %v2891_v33 = vpop.f32.mrb[84].mxu1  ;;  %2902 = vmatpush3.bf16.msra.mxu0 %v2010_v52 }
 0xbd8   :  { %v1963_v53 = vpop.f32.mrb[85].mxu1  ;;  %2903 = vmatprep.subr.bf16.mxu0 %v3283_v27  ;;  %v1972_v36 = vadd.f32 %v2891_v33, %v2295_v29 }
 0xbd9   :  { %v2892_v34 = vpop.f32.mrb[86].mxu1  ;;  %v1964_v39 = vadd.f32 %v2295_v29, %v1963_v53 }
 0xbda   :  { %v1975_v37 = vadd.f32 %v2892_v34, %v2295_v29  ;;  %v1966_v38 = vpop.f32.mrb[87].mxu1 }
 0xbdb   :  { %v1967_v40 = vadd.f32 %v2295_v29, %v1966_v38  ;;  %2904 = vmatpush3.bf16.msra.mxu0 %v2011_v51 }
 0xbdc   :  { %v2013_v41 = vpack.c.bf16 %v1975_v37, %v1972_v36  ;;  %2905 = vmatprep.subr.bf16.mxu0 %v3283_v27 }
 0xbdd   :  { %v2012_v42 = vpack.c.bf16 %v1967_v40, %v1964_v39 }
 0xbdf   :  { %v2895_v43 = vpop.f32.mrb[88].mxu1  ;;  %2906 = vmatpush3.bf16.msra.mxu0 %v2012_v42 }
 0xbe0   :  { %v1979_v44 = vpop.f32.mrb[89].mxu1  ;;  %2907 = vmatprep.subr.bf16.mxu0 %v3283_v27  ;;  %v1988_v46 = vadd.f32 %v2895_v43, %v2295_v29 }
 0xbe1   :  { %v2896_v45 = vpop.f32.mrb[90].mxu1  ;;  %v1980_v57 = vadd.f32 %v2295_v29, %v1979_v44 }
 0xbe2   :  { %v1991_v54 = vadd.f32 %v2896_v45, %v2295_v29  ;;  %v1982_v55 = vpop.f32.mrb[91].mxu1 }
 0xbe3   :  { %v1983_v58 = vadd.f32 %v2295_v29, %v1982_v55  ;;  %2908 = vmatpush3.bf16.msra.mxu0 %v2013_v41 }
 0xbe4   :  { %v2015_v59 = vpack.c.bf16 %v1991_v54, %v1988_v46  ;;  %2909 = vmatprep.subr.bf16.mxu0 %v3283_v27 }
 0xbe5   :  { %v2014_v3 = vpack.c.bf16 %v1983_v58, %v1980_v57 }
 0xbe7   :  { %v2899_v4 = vpop.f32.mrb[92].mxu1  ;;  %2910 = vmatpush3.bf16.msra.mxu0 %v2014_v3 }
 0xbe8   :  { %v1995_v6 = vpop.f32.mrb[93].mxu1  ;;  %2911 = vmatprep.subr.bf16.mxu0 %v3283_v27  ;;  %v2004_v7 = vadd.f32 %v2899_v4, %v2295_v29 }
 0xbe9   :  { %v2900_v2 = vpop.f32.mrb[94].mxu1  ;;  %v1996_v10 = vadd.f32 %v2295_v29, %v1995_v6 }
 0xbea   :  { %v2007_v8 = vadd.f32 %v2900_v2, %v2295_v29  ;;  %v1998_v9 = vpop.f32.mrb[95].mxu1 }
 0xbeb   :  { %v1999_v11 = vadd.f32 %v2295_v29, %v1998_v9  ;;  %2912 = vmatpush3.bf16.msra.mxu0 %v2015_v59 }
 0xbec   :  { %v2017_v35 = vpack.c.bf16 %v2007_v8, %v2004_v7  ;;  %2913 = vmatprep.subr.bf16.mxu0 %v3283_v27 }
 0xbed   :  { %v2016_v5 = vpack.c.bf16 %v1999_v11, %v1996_v10 }
 0xbef   :  { %2914 = vmatpush3.bf16.msra.mxu0 %v2016_v5 }
 0xbf0   :  { %2915 = vmatprep.subr.bf16.mxu0 %v3283_v27 }
 0xbf3   :  { %2916 = vmatpush3.bf16.msra.mxu0 %v2017_v35 }
 0xbf6   :  { %2918 = vmatmul.mubr.bf16.vlgmr.msra.gmra.mrb[96].mxu0 %v3013_v12 }
 0xcc9   :  { %v2060_v13 = vpop.f32.mrb[96].mxu0 }
 0xcca   :  { %v2919_v14 = vpop.f32.mrb[97].mxu0 }
 0xccb   :  { %v2063_v15 = vpop.f32.mrb[98].mxu0 }
 0xccc   :  { %v2067_v16 = vpack.c.bf16 %v2063_v15, %v2060_v13  ;;  %v2920_v17 = vpop.f32.mrb[99].mxu0 }
 0xcce   :  { %2938 = vmatmul.mubr.bf16.vlgmr.msra.gmra.mrb[96].mxu1 %v2067_v16 }
 0xda1   :  { %v2173_v21 = vpop.f32.mrb[96].mxu1 }
 0xda2   :  { %v2174_v22 = vadd.f32 %v2297_v20, %v2173_v21  ;;  %v2939_v23 = vpop.f32.mrb[97].mxu1 }
 0xda3   :  { %v2176_v24 = vpop.f32.mrb[98].mxu1 }
 0xda4   :  { %v2177_v26 = vadd.f32 %v2297_v20, %v2176_v24  ;;  %v2940_v27 = vpop.f32.mrb[99].mxu1  ;;  %v2183_v60 = vsel %vm2182_vm1, %v2174_v22, -1e+30 }
 0xda5   :  { %2185 = vmax.xlane.f32.xlu0 %v2183_v60 }
 0xda6   :  { %v2184_v61 = vsel %vm2182_vm1, %v2177_v26, -1e+30 }
 0xda9   :  { %2187 = vmax.xlane.f32.xlu0 %v2184_v61 }
 0xe32   :  { %v2186_v56 = vpop.xlane.xlu0 %2185 }
 0xe33   :  { %v2189_v62 = vsub.f32 %v2183_v60, %v2186_v56 }
 0xe35   :  { %v2191_v63 = vmul.f32 1.442695, %v2189_v62 }
 0xe36   :  { %v2188_v0 = vpop.xlane.xlu0 %2187 }
 0xe37   :  { %v2190_v1 = vsub.f32 %v2184_v61, %v2188_v0  ;;  %3022 = vpow2.f32 %v2191_v63 }
 0xe39   :  { %v2193_v28 = vmul.f32 1.442695, %v2190_v1 }
 0xe3b   :  { %3024 = vpow2.f32 %v2193_v28 }
 0xe41   :  { %v3023_v29 = vpop.eup %3022 }
 0xe42   :  { %2195 = vadd.xlane.f32.xlu1 %v3023_v29 }
 0xe45   :  { %v3025_v30 = vpop.eup %3024 }
 0xe46   :  { %2197 = vadd.xlane.f32.xlu1 %v3025_v30 }
 0xecf   :  { %v2196_v25 = vpop.xlane.xlu1 %2195 }
 0xed0   :  { %3026 = vlog2.f32 %v2196_v25 }
 0xed3   :  { %v2198_v32 = vpop.xlane.xlu1 %2197 }
 0xed4   :  { %3028 = vlog2.f32 %v2198_v32 }
 0xeda   :  { %v3027_v47 = vpop.eup %3026 }
 0xedb   :  { %v2200_v48 = vmul.f32 0.6931472, %v3027_v47 }
 0xedd   :  { %v2203_v49 = vsub.f32 %v2189_v62, %v2200_v48 }
 0xede   :  { %v3029_v50 = vpop.eup %3028 }
 0xedf   :  { %2205 = vst [vmem:[#allocation18] sm:$0xff] %v2203_v49  ;;  %v2202_v51 = vmul.f32 0.6931472, %v3029_v50 }
 0xee1   :  { %v2204_v52 = vsub.f32 %v2190_v1, %v2202_v51 }
 0xee3   :  { %2206 = vst [vmem:[#allocation18 + $0x8] sm:$0xff] %v2204_v52 }
 0xee4   :  { %3247 = shalt.err (!%p3244_p6)
}
 0xee5   :  { %s3248_s6 = scalar_lea.hbm %s3689_s17, 256 }
 0xee6   :  { %p3249_p7 = scmp.ne.s32.totalorder %s3689_s17, %s3248_s6  ;;  %p3252_p8 = scmp.lt.u32.totalorder %s3248_s6, %s3689_s17 }
 0xee8   :  { %p3254_p9 = pnand %p3252_p8, %p3249_p7 }
 0xeea   :  { %3257 = shalt.err (!%p3254_p9)
}
 0xeeb   :  { %s3286_s5 = smov 128   ;;  %s3287_s2 = smov 8  }
 0xeec   :  { %2218 = dma.vmem_to_hbm [thread:$0]  %s2213_s16, 256, %s3689_s17, [#allocation6], %s3286_s5, %s3286_s5, %s3287_s2  }
 0xeed   :  { %3270 = dma.done.wait [#allocation6], 256  }
 0xeee   :  { %3271 = vsyncadd [#allocation6], 4294967040 }
 0xeef   :  { %2222 = vsyncpa [#allocation5], 1 }
 0xef0   :  { %2223 = vsyncpa [#allocation8], 1 }
 0xef1   :  { %2224 = vsyncpa [#allocation11], 1 }
 0xef2   :  { %2225 = vsyncpa [#allocation14], 1 }
 0xef3   :  { %2226 = vsyncpa [#allocation17], 1 }
 0xef4   :  { %2227 = vsyncpa [#allocation6], 1 }
 0xef5   :  { %2228 = vsyncmov [#allocation3] }
 0xef8   :  { %s2229_s29 = vpop.sfrf %2228 }
 0xef9   :  { %p2306_p10 = scmp.ne.s32.totalorder %s2229_s29, 0 }
 0xefb   :  { %2233 = shalt.err (%p2306_p10)  }

</bundles_post_ra>
